<compile_context>
chip_gen: v7x
topology: tpu7x:2x2x1
jax: 0.10.0
libtpu: 0.0.40
codegen_flags: <defaults>
</compile_context>

<pallas_src>
import functools

import jax
import jax.numpy as jnp
from jax.experimental import pallas as pl
from jax.experimental.pallas import tpu as pltpu


def encoder_layer_kernel(x_ref,
                         wqkv_ref, bqkv_ref,
                         wo_ref, bo_ref,
                         w1_ref, b1_ref, w2_ref, b2_ref,
                         g1_ref, be1_ref, g2_ref, be2_ref,
                         o_ref,
                         qkv_ref, ctx_ref,
                         *, nhead, eps):
    """One (Bn, S, E) block of batch elements: MHA + FFN + two post-LayerNorms."""
    bn, S, E = x_ref.shape
    M = bn * S
    Dh = E // nhead

    x = x_ref[...].reshape(M, E).astype(jnp.float32)        # rows = (batch, seq)
    x_bf = x.astype(jnp.bfloat16)                            # bf16 MXU operand

    # ---------------- fused Q/K/V projection (one MXU launch) -----------------
    # wqkv columns: [Q heads | K heads | V heads], 1/sqrt(Dh) folded into Q.
    qkv = jnp.dot(x_bf, wqkv_ref[...],
                  preferred_element_type=jnp.float32) + bqkv_ref[...]
    qkv_ref[...] = qkv.astype(jnp.bfloat16)                  # stage in VMEM scratch

    # ---------------- per-head attention (no mask, eval mode) -----------------
    for h in range(nhead):                                   # static lane-slice loop
        qh = qkv_ref[:, h * Dh:(h + 1) * Dh]                 # (M, Dh) bf16
        kh = qkv_ref[:, E + h * Dh:E + (h + 1) * Dh]
        vh = qkv_ref[:, 2 * E + h * Dh:2 * E + (h + 1) * Dh]
        q3 = qh.reshape(bn, S, Dh)
        k3 = kh.reshape(bn, S, Dh)
        v3 = vh.reshape(bn, S, Dh)

        # Batched over the Bn tile; contracts last dims directly (no .T).
        s = jnp.einsum("bqd,bkd->bqk", q3, k3,
                       preferred_element_type=jnp.float32)    # (bn, S, S), f32
        s = s - jnp.max(s, axis=-1, keepdims=True)
        p = jnp.exp(s)
        p = p * pl.reciprocal(jnp.sum(p, axis=-1, keepdims=True), approx=True)
        ctx = jnp.einsum("bqk,bkd->bqd", p.astype(jnp.bfloat16), v3,
                         preferred_element_type=jnp.float32)  # (bn, S, Dh)

        # Write this head's context into its lane group of the (M, E) scratch.
        ctx_ref[:, h * Dh:(h + 1) * Dh] = ctx.reshape(M, Dh).astype(jnp.bfloat16)
    # TODO(synk): for long sequences (S >~ 1-2k) switch to a KV-tiled online
    # softmax (flash-style) so the (bn, S, S) score block stays VMEM-bounded.

    # Single full-K output projection (restores MXU K occupancy).
    attn = jnp.dot(ctx_ref[...], wo_ref[...],
                   preferred_element_type=jnp.float32) + bo_ref[...]
    # dropout1 is identity in eval mode.

    # ---------------- residual + LayerNorm1 (norm_first=False) ----------------
    y = x + attn
    mu = jnp.mean(y, axis=-1, keepdims=True)
    var = jnp.mean(y * y, axis=-1, keepdims=True) - mu * mu   # single-pass stats
    y = (y - mu) * jax.lax.rsqrt(var + eps) * g1_ref[...] + be1_ref[...]

    # ---------------- feed-forward (relu; dropout = identity) -----------------
    h1 = jnp.dot(y.astype(jnp.bfloat16), w1_ref[...],
                 preferred_element_type=jnp.float32) + b1_ref[...]
    h1 = jnp.maximum(h1, 0.0).astype(jnp.bfloat16)
    ff = jnp.dot(h1, w2_ref[...],
                 preferred_element_type=jnp.float32) + b2_ref[...]

    # ---------------- residual + LayerNorm2 -----------------------------------
    z = y + ff
    mu2 = jnp.mean(z, axis=-1, keepdims=True)
    var2 = jnp.mean(z * z, axis=-1, keepdims=True) - mu2 * mu2
    z = (z - mu2) * jax.lax.rsqrt(var2 + eps) * g2_ref[...] + be2_ref[...]

    o_ref[...] = z.reshape(bn, S, E).astype(o_ref.dtype)


def _vmem_capacity_bytes():
    """Per-core VMEM capacity; falls back to the smallest (v7x) if unknown."""
    try:
        cap = getattr(pltpu.get_tpu_info(), "vmem_capacity_bytes", None)
        if cap:
            return int(cap)
    except Exception:
        pass
    return 64 << 20


def _vmem_need_bytes(bn, S, E, F, nhead, weight_buffers=2):
    """Rough per-grid-step VMEM footprint (bytes)."""
    M = bn * S
    weights = weight_buffers * 2 * (4 * E * E + 2 * E * F)     # bf16 matmul weights
    smalls = weight_buffers * 4 * (12 * E + F)                 # f32 biases / LN params
    io_blocks = 2 * 2 * 4 * M * E                              # x + out, f32, double-buffered
    scratch = 2 * M * (3 * E + E)                              # bf16 qkv + ctx scratch
    live = 4 * M * (6 * E + F) + 8 * bn * S * S                # f32 intermediates, one head live
    return weights + smalls + io_blocks + scratch + live


def _pick_batch_block(N, S, E, F, nhead, vmem_cap):
    """Largest divisor of N whose per-step footprint fits the VMEM budget."""
    # 512 rows fully feeds the 256-wide MXU M dim on v6e/v7x; 256 elsewhere.
    target_rows = 512 if vmem_cap >= (100 << 20) else 256
    budget = max(int(vmem_cap * 0.8) - (8 << 20), 16 << 20)
    bn = max(1, min(N, max(1, target_rows // max(S, 1))))
    while N % bn:
        bn -= 1
    while bn > 1 and _vmem_need_bytes(bn, S, E, F, nhead) > budget:
        bn -= 1
        while N % bn:
            bn -= 1
    # TODO(synk): for prime/awkward N this degrades to bn=1; pad N (and mask
    # the ragged block) if the MXU M dimension must stay filled.
    return bn


def _vmem_limit_bytes(bn, S, E, F, nhead, vmem_cap):
    need = _vmem_need_bytes(bn, S, E, F, nhead) + (8 << 20)    # + compiler scratch slack
    return int(min(max(need, 32 << 20), int(vmem_cap * 0.85)))


def prepare_params(p, *, nhead):
    """One-time host-side prep: fold 1/sqrt(Dh) into the Q columns of the fused
    in-projection and cast all matmul weights to bf16 (f32 accumulation in-kernel)."""
    E = p["wo"].shape[0]
    assert E % nhead == 0
    Dh = E // nhead
    scale = jnp.concatenate(
        [jnp.full((1, E), Dh ** -0.5, jnp.float32), jnp.ones((1, 2 * E), jnp.float32)],
        axis=1)
    return {
        "wqkv": (p["wqkv"] * scale).astype(jnp.bfloat16),      # (E, 3E), Q scaled
        "bqkv": (p["bqkv"] * scale).astype(jnp.float32),       # (1, 3E)
        "wo": p["wo"].astype(jnp.bfloat16),                    # (E, E)
        "bo": p["bo"].astype(jnp.float32),
        "w1": p["w1"].astype(jnp.bfloat16), "b1": p["b1"].astype(jnp.float32),
        "w2": p["w2"].astype(jnp.bfloat16), "b2": p["b2"].astype(jnp.float32),
        "g1": p["g1"].astype(jnp.float32), "be1": p["be1"].astype(jnp.float32),
        "g2": p["g2"].astype(jnp.float32), "be2": p["be2"].astype(jnp.float32),
    }


def transformer_encoder_layer(src, prepared, *, nhead, eps=1e-5,
                              batch_first=False, out_dtype=None):
    """src: (S, N, E) if batch_first=False (PyTorch default), else (N, S, E).
    Returns the same layout.  out_dtype can be set to bf16 to halve output DMA
    bytes when stacking layers (default keeps the input dtype)."""
    if batch_first:
        x = src
    else:
        # TODO(synk): when stacking layers, keep activations batch-first between
        # layers (batch_first=True) so this HBM transpose is paid once per model.
        x = jnp.transpose(src, (1, 0, 2))                      # (N, S, E)
    N, S, E = x.shape
    F = prepared["w1"].shape[1]
    assert E % nhead == 0
    out_dtype = out_dtype or src.dtype

    vmem_cap = _vmem_capacity_bytes()
    bn = _pick_batch_block(N, S, E, F, nhead, vmem_cap)
    grid = (N // bn,)
    M = bn * S

    flops = 2 * N * S * E * (4 * E + 2 * F) + 4 * N * S * S * E
    cost = pl.CostEstimate(
        flops=flops,
        transcendentals=N * nhead * S * S,
        bytes_accessed=8 * N * S * E + 2 * (4 * E * E + 2 * E * F))

    kernel = functools.partial(encoder_layer_kernel, nhead=nhead, eps=eps)

    def run(single_buffer_weights):
        def const_spec(shape):
            zeros = (0,) * len(shape)
            index_map = lambda n, z=zeros: z
            if single_buffer_weights:
                try:
                    # Constant block index => one buffer is enough; default
                    # double-buffering would waste a full weight copy of VMEM.
                    return pl.BlockSpec(shape, index_map, pipeline_mode=pl.Buffered(1))
                except (TypeError, AttributeError):
                    return pl.BlockSpec(shape, index_map)
            return pl.BlockSpec(shape, index_map)

        in_specs = [
            pl.BlockSpec((bn, S, E), lambda n: (n, 0, 0)),     # x block
            const_spec((E, 3 * E)),                            # fused QKV weight (bf16)
            const_spec((1, 3 * E)),                            # fused QKV bias (scale folded)
            const_spec((E, E)),                                # wo
            const_spec((1, E)),                                # bo
            const_spec((E, F)),                                # w1
            const_spec((1, F)),                                # b1
            const_spec((F, E)),                                # w2
            const_spec((1, E)),                                # b2
            const_spec((1, E)), const_spec((1, E)),            # norm1 gamma / beta
            const_spec((1, E)), const_spec((1, E)),            # norm2 gamma / beta
        ]
        return pl.pallas_call(
            kernel,
            out_shape=jax.ShapeDtypeStruct((N, S, E), out_dtype),
            grid=grid,
            in_specs=in_specs,
            out_specs=pl.BlockSpec((bn, S, E), lambda n: (n, 0, 0)),
            scratch_shapes=[
                pltpu.VMEM((M, 3 * E), jnp.bfloat16),          # staged QKV activations
                pltpu.VMEM((M, E), jnp.bfloat16),              # per-head contexts
            ],
            compiler_params=pltpu.CompilerParams(
                dimension_semantics=("parallel",),
                vmem_limit_bytes=_vmem_limit_bytes(bn, S, E, F, nhead, vmem_cap)),
            cost_estimate=cost,
        )(x,
          prepared["wqkv"], prepared["bqkv"],
          prepared["wo"], prepared["bo"],
          prepared["w1"], prepared["b1"], prepared["w2"], prepared["b2"],
          prepared["g1"], prepared["be1"], prepared["g2"], prepared["be2"])

    try:
        out = run(True)
    except Exception:
        # Compatibility fallback: some JAX versions reject pl.Buffered(1) on
        # pallas_call BlockSpecs; rerun with default double-buffered weights.
        out = run(False)

    return out if batch_first else jnp.transpose(out, (1, 0, 2))


def ref_forward(src, p, *, nhead, eps=1e-5):
    """Pure-JAX f32 reference of the PyTorch forward (eval mode)."""
    S, N, E = src.shape
    Dh = E // nhead
    xb = jnp.transpose(src, (1, 0, 2)).astype(jnp.float32)
    qkv = xb @ p["wqkv"] + p["bqkv"]
    q = qkv[..., :E] * (Dh ** -0.5)
    k = qkv[..., E:2 * E]
    v = qkv[..., 2 * E:]
    q = q.reshape(N, S, nhead, Dh).transpose(0, 2, 1, 3)
    k = k.reshape(N, S, nhead, Dh).transpose(0, 2, 1, 3)
    v = v.reshape(N, S, nhead, Dh).transpose(0, 2, 1, 3)
    s = jnp.einsum("nhqd,nhkd->nhqk", q, k)
    a = jnp.einsum("nhqk,nhkd->nhqd", jax.nn.softmax(s, axis=-1), v)
    a = a.transpose(0, 2, 1, 3).reshape(N, S, E) @ p["wo"] + p["bo"]

    def ln(t, g, b):
        mu = t.mean(-1, keepdims=True)
        var = ((t - mu) ** 2).mean(-1, keepdims=True)
        return (t - mu) / jnp.sqrt(var + eps) * g + b

    y = ln(xb + a, p["g1"], p["be1"])
    ff = jnp.maximum(y @ p["w1"] + p["b1"], 0.0) @ p["w2"] + p["b2"]
    z = ln(y + ff, p["g2"], p["be2"])
    return jnp.transpose(z, (1, 0, 2))


def make_params(key, d_model, nhead, dim_feedforward):
    """Deterministic synthetic parameters (already transposed for x @ W)."""
    ks = jax.random.split(key, 8)
    std = 0.05
    return {
        "wqkv": std * jax.random.normal(ks[0], (d_model, 3 * d_model), jnp.float32),
        "bqkv": std * jax.random.normal(ks[1], (1, 3 * d_model), jnp.float32),
        "wo":   std * jax.random.normal(ks[2], (d_model, d_model), jnp.float32),
        "bo":   std * jax.random.normal(ks[3], (1, d_model), jnp.float32),
        "w1":   std * jax.random.normal(ks[4], (d_model, dim_feedforward), jnp.float32),
        "b1":   std * jax.random.normal(ks[5], (1, dim_feedforward), jnp.float32),
        "w2":   std * jax.random.normal(ks[6], (dim_feedforward, d_model), jnp.float32),
        "b2":   std * jax.random.normal(ks[7], (1, d_model), jnp.float32),
        "g1":   jnp.ones((1, d_model), jnp.float32),
        "be1":  jnp.zeros((1, d_model), jnp.float32),
        "g2":   jnp.ones((1, d_model), jnp.float32),
        "be2":  jnp.zeros((1, d_model), jnp.float32),
    }


if __name__ == "__main__":
    S, N, E = 8, 2, 32          # seq, batch, d_model
    NHEAD = 4
    FF = 64

    key = jax.random.PRNGKey(0)
    k_x, k_p = jax.random.split(key)
    src = jax.random.normal(k_x, (S, N, E), jnp.float32)   # (seq, batch, feature)
    params = make_params(k_p, E, NHEAD, FF)
    prepared = prepare_params(params, nhead=NHEAD)          # one-time host-side prep

    out = transformer_encoder_layer(src, prepared, nhead=NHEAD, eps=1e-5)
    out = jax.block_until_ready(out)

    ref = ref_forward(src, params, nhead=NHEAD, eps=1e-5)
    assert out.shape == (S, N, E)
    # bf16 MXU operands (f32 accumulation) -> loosened tolerance vs. pure-f32 ref.
    max_err = float(jnp.max(jnp.abs(out - ref)))
    assert max_err < 3e-2, max_err

    print("KERNEL_OK")
</pallas_src>

<mosaic_0001>
module attributes {stable_mosaic.version = 11 : i64} {
  func.func @encoder_layer_kernel(%arg0: i32, %arg1: memref<2x8x32xf32, #tpu.memory_space<vmem>>, %arg2: memref<32x96xbf16, #tpu.memory_space<vmem>>, %arg3: memref<1x96xf32, #tpu.memory_space<vmem>>, %arg4: memref<32x32xbf16, #tpu.memory_space<vmem>>, %arg5: memref<1x32xf32, #tpu.memory_space<vmem>>, %arg6: memref<32x64xbf16, #tpu.memory_space<vmem>>, %arg7: memref<1x64xf32, #tpu.memory_space<vmem>>, %arg8: memref<64x32xbf16, #tpu.memory_space<vmem>>, %arg9: memref<1x32xf32, #tpu.memory_space<vmem>>, %arg10: memref<1x32xf32, #tpu.memory_space<vmem>>, %arg11: memref<1x32xf32, #tpu.memory_space<vmem>>, %arg12: memref<1x32xf32, #tpu.memory_space<vmem>>, %arg13: memref<1x32xf32, #tpu.memory_space<vmem>>, %arg14: memref<2x8x32xf32, #tpu.memory_space<vmem>>, %arg15: memref<16x96xbf16, #tpu.memory_space<vmem>>, %arg16: memref<16x32xbf16, #tpu.memory_space<vmem>>) attributes {dimension_semantics = [#tpu.dimension_semantics<parallel>], iteration_bounds = array<i64: 1>, scalar_prefetch = 0 : i64, scratch_operands = 2 : i64, tpu.core_type = #tpu.core_type<tc>, window_params = [{transform_indices = @transform_0, window_bounds = array<i64: 2, 8, 32>}, {pipeline_mode = #tpu.pipeline_mode<synchronous>, transform_indices = @transform_1, window_bounds = array<i64: 32, 96>}, {pipeline_mode = #tpu.pipeline_mode<synchronous>, transform_indices = @transform_2, window_bounds = array<i64: 1, 96>}, {pipeline_mode = #tpu.pipeline_mode<synchronous>, transform_indices = @transform_3, window_bounds = array<i64: 32, 32>}, {pipeline_mode = #tpu.pipeline_mode<synchronous>, transform_indices = @transform_4, window_bounds = array<i64: 1, 32>}, {pipeline_mode = #tpu.pipeline_mode<synchronous>, transform_indices = @transform_5, window_bounds = array<i64: 32, 64>}, {pipeline_mode = #tpu.pipeline_mode<synchronous>, transform_indices = @transform_6, window_bounds = array<i64: 1, 64>}, {pipeline_mode = #tpu.pipeline_mode<synchronous>, transform_indices = @transform_7, window_bounds = array<i64: 64, 32>}, {pipeline_mode = #tpu.pipeline_mode<synchronous>, transform_indices = @transform_8, window_bounds = array<i64: 1, 32>}, {pipeline_mode = #tpu.pipeline_mode<synchronous>, transform_indices = @transform_9, window_bounds = array<i64: 1, 32>}, {pipeline_mode = #tpu.pipeline_mode<synchronous>, transform_indices = @transform_10, window_bounds = array<i64: 1, 32>}, {pipeline_mode = #tpu.pipeline_mode<synchronous>, transform_indices = @transform_11, window_bounds = array<i64: 1, 32>}, {pipeline_mode = #tpu.pipeline_mode<synchronous>, transform_indices = @transform_12, window_bounds = array<i64: 1, 32>}, {transform_indices = @transform_13, window_bounds = array<i64: 2, 8, 32>}]} {
    %c0 = arith.constant 0 : index
    %c0_0 = arith.constant 0 : index
    %c0_1 = arith.constant 0 : index
    %0 = vector.load %arg1[%c0, %c0_0, %c0_1] : memref<2x8x32xf32, #tpu.memory_space<vmem>>, vector<2x8x32xf32>
    %1 = vector.shape_cast %0 : vector<2x8x32xf32> to vector<16x32xf32>
    %2 = arith.truncf %1 : vector<16x32xf32> to vector<16x32xbf16>
    %c0_2 = arith.constant 0 : index
    %c0_3 = arith.constant 0 : index
    %3 = vector.load %arg2[%c0_2, %c0_3] : memref<32x96xbf16, #tpu.memory_space<vmem>>, vector<32x96xbf16>
    %cst = arith.constant dense<0.000000e+00> : vector<16x96xf32>
    %4 = tpu.matmul %2, %3, %cst {dimension_numbers = #tpu.dot_dimension_numbers<[1], [0], [0], [1], [0, 0, 1, 1], [], []>} : vector<16x32xbf16>, vector<32x96xbf16>, vector<16x96xf32> -> vector<16x96xf32>
    %c0_4 = arith.constant 0 : index
    %c0_5 = arith.constant 0 : index
    %5 = vector.load %arg3[%c0_4, %c0_5] : memref<1x96xf32, #tpu.memory_space<vmem>>, vector<1x96xf32>
    %6 = vector.broadcast %5 : vector<1x96xf32> to vector<16x96xf32>
    %7 = arith.addf %4, %6 : vector<16x96xf32>
    %8 = arith.truncf %7 : vector<16x96xf32> to vector<16x96xbf16>
    %c0_6 = arith.constant 0 : index
    %c0_7 = arith.constant 0 : index
    %9 = vector.load %arg15[%c0_6, %c0_7] : memref<16x96xbf16, #tpu.memory_space<vmem>>, vector<16x96xbf16>
    tpu.vector_store %arg15[%c0_6, %c0_7], %8 {strides = array<i32>} : memref<16x96xbf16, #tpu.memory_space<vmem>>, vector<16x96xbf16>,
    %c0_8 = arith.constant 0 : index
    %c0_9 = arith.constant 0 : index
    %10 = vector.load %arg15[%c0_8, %c0_9] : memref<16x96xbf16, #tpu.memory_space<vmem>>, vector<16x8xbf16>
    %c0_10 = arith.constant 0 : index
    %c32 = arith.constant 32 : index
    %11 = vector.load %arg15[%c0_10, %c32] : memref<16x96xbf16, #tpu.memory_space<vmem>>, vector<16x8xbf16>
    %c0_11 = arith.constant 0 : index
    %c64 = arith.constant 64 : index
    %12 = vector.load %arg15[%c0_11, %c64] : memref<16x96xbf16, #tpu.memory_space<vmem>>, vector<16x8xbf16>
    %13 = vector.shape_cast %10 : vector<16x8xbf16> to vector<2x8x8xbf16>
    %14 = vector.shape_cast %11 : vector<16x8xbf16> to vector<2x8x8xbf16>
    %15 = vector.shape_cast %12 : vector<16x8xbf16> to vector<2x8x8xbf16>
    "tpu.trace_start"() <{level = 10 : i32, message = "bqd,bkd->bqk"}> : () -> ()
    %cst_12 = arith.constant dense<0.000000e+00> : vector<2x8x8xf32>
    %16 = tpu.matmul %13, %14, %cst_12 {dimension_numbers = #tpu.dot_dimension_numbers<[2], [2], [1], [1], [0, 0, 0, 1, 1, 1], [0], [0]>} : vector<2x8x8xbf16>, vector<2x8x8xbf16>, vector<2x8x8xf32> -> vector<2x8x8xf32>
    "tpu.trace_stop"() : () -> ()
    %cst_13 = arith.constant dense<0xFF800000> : vector<2x8xf32>
    %17 = vector.multi_reduction <maximumf>, %16, %cst_13 [2] : vector<2x8x8xf32> to vector<2x8xf32>
    %18 = vector.shape_cast %17 : vector<2x8xf32> to vector<2x8x1xf32>
    %19 = vector.broadcast %18 : vector<2x8x1xf32> to vector<2x8x8xf32>
    %20 = arith.subf %16, %19 : vector<2x8x8xf32>
    %21 = math.exp %20 : vector<2x8x8xf32>
    %cst_14 = arith.constant dense<0.000000e+00> : vector<2x8xf32>
    %22 = vector.multi_reduction <add>, %21, %cst_14 [2] : vector<2x8x8xf32> to vector<2x8xf32>
    %23 = vector.shape_cast %22 : vector<2x8xf32> to vector<2x8x1xf32>
    %24 = tpu.reciprocal %23 {approx = true} : vector<2x8x1xf32> -> vector<2x8x1xf32>
    %25 = vector.broadcast %24 : vector<2x8x1xf32> to vector<2x8x8xf32>
    %26 = arith.mulf %21, %25 : vector<2x8x8xf32>
    %27 = arith.truncf %26 : vector<2x8x8xf32> to vector<2x8x8xbf16>
    "tpu.trace_start"() <{level = 10 : i32, message = "bqk,bkd->bqd"}> : () -> ()
    %cst_15 = arith.constant dense<0.000000e+00> : vector<2x8x8xf32>
    %28 = tpu.matmul %27, %15, %cst_15 {dimension_numbers = #tpu.dot_dimension_numbers<[2], [1], [1], [2], [0, 0, 0, 1, 1, 2], [0], [0]>} : vector<2x8x8xbf16>, vector<2x8x8xbf16>, vector<2x8x8xf32> -> vector<2x8x8xf32>
    "tpu.trace_stop"() : () -> ()
    %29 = vector.shape_cast %28 : vector<2x8x8xf32> to vector<16x8xf32>
    %30 = arith.truncf %29 : vector<16x8xf32> to vector<16x8xbf16>
    %c0_16 = arith.constant 0 : index
    %c0_17 = arith.constant 0 : index
    %31 = vector.load %arg16[%c0_16, %c0_17] : memref<16x32xbf16, #tpu.memory_space<vmem>>, vector<16x8xbf16>
    tpu.vector_store %arg16[%c0_16, %c0_17], %30 {strides = array<i32>} : memref<16x32xbf16, #tpu.memory_space<vmem>>, vector<16x8xbf16>,
    %c0_18 = arith.constant 0 : index
    %c8 = arith.constant 8 : index
    %32 = vector.load %arg15[%c0_18, %c8] : memref<16x96xbf16, #tpu.memory_space<vmem>>, vector<16x8xbf16>
    %c0_19 = arith.constant 0 : index
    %c40 = arith.constant 40 : index
    %33 = vector.load %arg15[%c0_19, %c40] : memref<16x96xbf16, #tpu.memory_space<vmem>>, vector<16x8xbf16>
    %c0_20 = arith.constant 0 : index
    %c72 = arith.constant 72 : index
    %34 = vector.load %arg15[%c0_20, %c72] : memref<16x96xbf16, #tpu.memory_space<vmem>>, vector<16x8xbf16>
    %35 = vector.shape_cast %32 : vector<16x8xbf16> to vector<2x8x8xbf16>
    %36 = vector.shape_cast %33 : vector<16x8xbf16> to vector<2x8x8xbf16>
    %37 = vector.shape_cast %34 : vector<16x8xbf16> to vector<2x8x8xbf16>
    "tpu.trace_start"() <{level = 10 : i32, message = "bqd,bkd->bqk"}> : () -> ()
    %cst_21 = arith.constant dense<0.000000e+00> : vector<2x8x8xf32>
    %38 = tpu.matmul %35, %36, %cst_21 {dimension_numbers = #tpu.dot_dimension_numbers<[2], [2], [1], [1], [0, 0, 0, 1, 1, 1], [0], [0]>} : vector<2x8x8xbf16>, vector<2x8x8xbf16>, vector<2x8x8xf32> -> vector<2x8x8xf32>
    "tpu.trace_stop"() : () -> ()
    %cst_22 = arith.constant dense<0xFF800000> : vector<2x8xf32>
    %39 = vector.multi_reduction <maximumf>, %38, %cst_22 [2] : vector<2x8x8xf32> to vector<2x8xf32>
    %40 = vector.shape_cast %39 : vector<2x8xf32> to vector<2x8x1xf32>
    %41 = vector.broadcast %40 : vector<2x8x1xf32> to vector<2x8x8xf32>
    %42 = arith.subf %38, %41 : vector<2x8x8xf32>
    %43 = math.exp %42 : vector<2x8x8xf32>
    %cst_23 = arith.constant dense<0.000000e+00> : vector<2x8xf32>
    %44 = vector.multi_reduction <add>, %43, %cst_23 [2] : vector<2x8x8xf32> to vector<2x8xf32>
    %45 = vector.shape_cast %44 : vector<2x8xf32> to vector<2x8x1xf32>
    %46 = tpu.reciprocal %45 {approx = true} : vector<2x8x1xf32> -> vector<2x8x1xf32>
    %47 = vector.broadcast %46 : vector<2x8x1xf32> to vector<2x8x8xf32>
    %48 = arith.mulf %43, %47 : vector<2x8x8xf32>
    %49 = arith.truncf %48 : vector<2x8x8xf32> to vector<2x8x8xbf16>
    "tpu.trace_start"() <{level = 10 : i32, message = "bqk,bkd->bqd"}> : () -> ()
    %cst_24 = arith.constant dense<0.000000e+00> : vector<2x8x8xf32>
    %50 = tpu.matmul %49, %37, %cst_24 {dimension_numbers = #tpu.dot_dimension_numbers<[2], [1], [1], [2], [0, 0, 0, 1, 1, 2], [0], [0]>} : vector<2x8x8xbf16>, vector<2x8x8xbf16>, vector<2x8x8xf32> -> vector<2x8x8xf32>
    "tpu.trace_stop"() : () -> ()
    %51 = vector.shape_cast %50 : vector<2x8x8xf32> to vector<16x8xf32>
    %52 = arith.truncf %51 : vector<16x8xf32> to vector<16x8xbf16>
    %c0_25 = arith.constant 0 : index
    %c8_26 = arith.constant 8 : index
    %53 = vector.load %arg16[%c0_25, %c8_26] : memref<16x32xbf16, #tpu.memory_space<vmem>>, vector<16x8xbf16>
    tpu.vector_store %arg16[%c0_25, %c8_26], %52 {strides = array<i32>} : memref<16x32xbf16, #tpu.memory_space<vmem>>, vector<16x8xbf16>,
    %c0_27 = arith.constant 0 : index
    %c16 = arith.constant 16 : index
    %54 = vector.load %arg15[%c0_27, %c16] : memref<16x96xbf16, #tpu.memory_space<vmem>>, vector<16x8xbf16>
    %c0_28 = arith.constant 0 : index
    %c48 = arith.constant 48 : index
    %55 = vector.load %arg15[%c0_28, %c48] : memref<16x96xbf16, #tpu.memory_space<vmem>>, vector<16x8xbf16>
    %c0_29 = arith.constant 0 : index
    %c80 = arith.constant 80 : index
    %56 = vector.load %arg15[%c0_29, %c80] : memref<16x96xbf16, #tpu.memory_space<vmem>>, vector<16x8xbf16>
    %57 = vector.shape_cast %54 : vector<16x8xbf16> to vector<2x8x8xbf16>
    %58 = vector.shape_cast %55 : vector<16x8xbf16> to vector<2x8x8xbf16>
    %59 = vector.shape_cast %56 : vector<16x8xbf16> to vector<2x8x8xbf16>
    "tpu.trace_start"() <{level = 10 : i32, message = "bqd,bkd->bqk"}> : () -> ()
    %cst_30 = arith.constant dense<0.000000e+00> : vector<2x8x8xf32>
    %60 = tpu.matmul %57, %58, %cst_30 {dimension_numbers = #tpu.dot_dimension_numbers<[2], [2], [1], [1], [0, 0, 0, 1, 1, 1], [0], [0]>} : vector<2x8x8xbf16>, vector<2x8x8xbf16>, vector<2x8x8xf32> -> vector<2x8x8xf32>
    "tpu.trace_stop"() : () -> ()
    %cst_31 = arith.constant dense<0xFF800000> : vector<2x8xf32>
    %61 = vector.multi_reduction <maximumf>, %60, %cst_31 [2] : vector<2x8x8xf32> to vector<2x8xf32>
    %62 = vector.shape_cast %61 : vector<2x8xf32> to vector<2x8x1xf32>
    %63 = vector.broadcast %62 : vector<2x8x1xf32> to vector<2x8x8xf32>
    %64 = arith.subf %60, %63 : vector<2x8x8xf32>
    %65 = math.exp %64 : vector<2x8x8xf32>
    %cst_32 = arith.constant dense<0.000000e+00> : vector<2x8xf32>
    %66 = vector.multi_reduction <add>, %65, %cst_32 [2] : vector<2x8x8xf32> to vector<2x8xf32>
    %67 = vector.shape_cast %66 : vector<2x8xf32> to vector<2x8x1xf32>
    %68 = tpu.reciprocal %67 {approx = true} : vector<2x8x1xf32> -> vector<2x8x1xf32>
    %69 = vector.broadcast %68 : vector<2x8x1xf32> to vector<2x8x8xf32>
    %70 = arith.mulf %65, %69 : vector<2x8x8xf32>
    %71 = arith.truncf %70 : vector<2x8x8xf32> to vector<2x8x8xbf16>
    "tpu.trace_start"() <{level = 10 : i32, message = "bqk,bkd->bqd"}> : () -> ()
    %cst_33 = arith.constant dense<0.000000e+00> : vector<2x8x8xf32>
    %72 = tpu.matmul %71, %59, %cst_33 {dimension_numbers = #tpu.dot_dimension_numbers<[2], [1], [1], [2], [0, 0, 0, 1, 1, 2], [0], [0]>} : vector<2x8x8xbf16>, vector<2x8x8xbf16>, vector<2x8x8xf32> -> vector<2x8x8xf32>
    "tpu.trace_stop"() : () -> ()
    %73 = vector.shape_cast %72 : vector<2x8x8xf32> to vector<16x8xf32>
    %74 = arith.truncf %73 : vector<16x8xf32> to vector<16x8xbf16>
    %c0_34 = arith.constant 0 : index
    %c16_35 = arith.constant 16 : index
    %75 = vector.load %arg16[%c0_34, %c16_35] : memref<16x32xbf16, #tpu.memory_space<vmem>>, vector<16x8xbf16>
    tpu.vector_store %arg16[%c0_34, %c16_35], %74 {strides = array<i32>} : memref<16x32xbf16, #tpu.memory_space<vmem>>, vector<16x8xbf16>,
    %c0_36 = arith.constant 0 : index
    %c24 = arith.constant 24 : index
    %76 = vector.load %arg15[%c0_36, %c24] : memref<16x96xbf16, #tpu.memory_space<vmem>>, vector<16x8xbf16>
    %c0_37 = arith.constant 0 : index
    %c56 = arith.constant 56 : index
    %77 = vector.load %arg15[%c0_37, %c56] : memref<16x96xbf16, #tpu.memory_space<vmem>>, vector<16x8xbf16>
    %c0_38 = arith.constant 0 : index
    %c88 = arith.constant 88 : index
    %78 = vector.load %arg15[%c0_38, %c88] : memref<16x96xbf16, #tpu.memory_space<vmem>>, vector<16x8xbf16>
    %79 = vector.shape_cast %76 : vector<16x8xbf16> to vector<2x8x8xbf16>
    %80 = vector.shape_cast %77 : vector<16x8xbf16> to vector<2x8x8xbf16>
    %81 = vector.shape_cast %78 : vector<16x8xbf16> to vector<2x8x8xbf16>
    "tpu.trace_start"() <{level = 10 : i32, message = "bqd,bkd->bqk"}> : () -> ()
    %cst_39 = arith.constant dense<0.000000e+00> : vector<2x8x8xf32>
    %82 = tpu.matmul %79, %80, %cst_39 {dimension_numbers = #tpu.dot_dimension_numbers<[2], [2], [1], [1], [0, 0, 0, 1, 1, 1], [0], [0]>} : vector<2x8x8xbf16>, vector<2x8x8xbf16>, vector<2x8x8xf32> -> vector<2x8x8xf32>
    "tpu.trace_stop"() : () -> ()
    %cst_40 = arith.constant dense<0xFF800000> : vector<2x8xf32>
    %83 = vector.multi_reduction <maximumf>, %82, %cst_40 [2] : vector<2x8x8xf32> to vector<2x8xf32>
    %84 = vector.shape_cast %83 : vector<2x8xf32> to vector<2x8x1xf32>
    %85 = vector.broadcast %84 : vector<2x8x1xf32> to vector<2x8x8xf32>
    %86 = arith.subf %82, %85 : vector<2x8x8xf32>
    %87 = math.exp %86 : vector<2x8x8xf32>
    %cst_41 = arith.constant dense<0.000000e+00> : vector<2x8xf32>
    %88 = vector.multi_reduction <add>, %87, %cst_41 [2] : vector<2x8x8xf32> to vector<2x8xf32>
    %89 = vector.shape_cast %88 : vector<2x8xf32> to vector<2x8x1xf32>
    %90 = tpu.reciprocal %89 {approx = true} : vector<2x8x1xf32> -> vector<2x8x1xf32>
    %91 = vector.broadcast %90 : vector<2x8x1xf32> to vector<2x8x8xf32>
    %92 = arith.mulf %87, %91 : vector<2x8x8xf32>
    %93 = arith.truncf %92 : vector<2x8x8xf32> to vector<2x8x8xbf16>
    "tpu.trace_start"() <{level = 10 : i32, message = "bqk,bkd->bqd"}> : () -> ()
    %cst_42 = arith.constant dense<0.000000e+00> : vector<2x8x8xf32>
    %94 = tpu.matmul %93, %81, %cst_42 {dimension_numbers = #tpu.dot_dimension_numbers<[2], [1], [1], [2], [0, 0, 0, 1, 1, 2], [0], [0]>} : vector<2x8x8xbf16>, vector<2x8x8xbf16>, vector<2x8x8xf32> -> vector<2x8x8xf32>
    "tpu.trace_stop"() : () -> ()
    %95 = vector.shape_cast %94 : vector<2x8x8xf32> to vector<16x8xf32>
    %96 = arith.truncf %95 : vector<16x8xf32> to vector<16x8xbf16>
    %c0_43 = arith.constant 0 : index
    %c24_44 = arith.constant 24 : index
    %97 = vector.load %arg16[%c0_43, %c24_44] : memref<16x32xbf16, #tpu.memory_space<vmem>>, vector<16x8xbf16>
    tpu.vector_store %arg16[%c0_43, %c24_44], %96 {strides = array<i32>} : memref<16x32xbf16, #tpu.memory_space<vmem>>, vector<16x8xbf16>,
    %c0_45 = arith.constant 0 : index
    %c0_46 = arith.constant 0 : index
    %98 = vector.load %arg16[%c0_45, %c0_46] : memref<16x32xbf16, #tpu.memory_space<vmem>>, vector<16x32xbf16>
    %c0_47 = arith.constant 0 : index
    %c0_48 = arith.constant 0 : index
    %99 = vector.load %arg4[%c0_47, %c0_48] : memref<32x32xbf16, #tpu.memory_space<vmem>>, vector<32x32xbf16>
    %cst_49 = arith.constant dense<0.000000e+00> : vector<16x32xf32>
    %100 = tpu.matmul %98, %99, %cst_49 {dimension_numbers = #tpu.dot_dimension_numbers<[1], [0], [0], [1], [0, 0, 1, 1], [], []>} : vector<16x32xbf16>, vector<32x32xbf16>, vector<16x32xf32> -> vector<16x32xf32>
    %c0_50 = arith.constant 0 : index
    %c0_51 = arith.constant 0 : index
    %101 = vector.load %arg5[%c0_50, %c0_51] : memref<1x32xf32, #tpu.memory_space<vmem>>, vector<1x32xf32>
    %102 = vector.broadcast %101 : vector<1x32xf32> to vector<16x32xf32>
    %103 = arith.addf %100, %102 : vector<16x32xf32>
    %104 = arith.addf %1, %103 : vector<16x32xf32>
    %cst_52 = arith.constant dense<0.000000e+00> : vector<16xf32>
    %105 = vector.multi_reduction <add>, %104, %cst_52 [1] : vector<16x32xf32> to vector<16xf32>
    %106 = vector.shape_cast %105 : vector<16xf32> to vector<16x1xf32>
    %cst_53 = arith.constant 3.200000e+01 : f32
    %107 = vector.broadcast %cst_53 : f32 to vector<16x1xf32>
    %108 = arith.divf %106, %107 : vector<16x1xf32>
    %109 = arith.mulf %104, %104 : vector<16x32xf32>
    %cst_54 = arith.constant dense<0.000000e+00> : vector<16xf32>
    %110 = vector.multi_reduction <add>, %109, %cst_54 [1] : vector<16x32xf32> to vector<16xf32>
    %111 = vector.shape_cast %110 : vector<16xf32> to vector<16x1xf32>
    %cst_55 = arith.constant 3.200000e+01 : f32
    %112 = vector.broadcast %cst_55 : f32 to vector<16x1xf32>
    %113 = arith.divf %111, %112 : vector<16x1xf32>
    %114 = arith.mulf %108, %108 : vector<16x1xf32>
    %115 = arith.subf %113, %114 : vector<16x1xf32>
    %116 = vector.broadcast %108 : vector<16x1xf32> to vector<16x32xf32>
    %117 = arith.subf %104, %116 : vector<16x32xf32>
    %cst_56 = arith.constant 9.99999974E-6 : f32
    %118 = vector.broadcast %cst_56 : f32 to vector<16x1xf32>
    %119 = arith.addf %115, %118 : vector<16x1xf32>
    %120 = math.rsqrt %119 : vector<16x1xf32>
    %121 = vector.broadcast %120 : vector<16x1xf32> to vector<16x32xf32>
    %122 = arith.mulf %117, %121 : vector<16x32xf32>
    %c0_57 = arith.constant 0 : index
    %c0_58 = arith.constant 0 : index
    %123 = vector.load %arg10[%c0_57, %c0_58] : memref<1x32xf32, #tpu.memory_space<vmem>>, vector<1x32xf32>
    %124 = vector.broadcast %123 : vector<1x32xf32> to vector<16x32xf32>
    %125 = arith.mulf %122, %124 : vector<16x32xf32>
    %c0_59 = arith.constant 0 : index
    %c0_60 = arith.constant 0 : index
    %126 = vector.load %arg11[%c0_59, %c0_60] : memref<1x32xf32, #tpu.memory_space<vmem>>, vector<1x32xf32>
    %127 = vector.broadcast %126 : vector<1x32xf32> to vector<16x32xf32>
    %128 = arith.addf %125, %127 : vector<16x32xf32>
    %129 = arith.truncf %128 : vector<16x32xf32> to vector<16x32xbf16>
    %c0_61 = arith.constant 0 : index
    %c0_62 = arith.constant 0 : index
    %130 = vector.load %arg6[%c0_61, %c0_62] : memref<32x64xbf16, #tpu.memory_space<vmem>>, vector<32x64xbf16>
    %cst_63 = arith.constant dense<0.000000e+00> : vector<16x64xf32>
    %131 = tpu.matmul %129, %130, %cst_63 {dimension_numbers = #tpu.dot_dimension_numbers<[1], [0], [0], [1], [0, 0, 1, 1], [], []>} : vector<16x32xbf16>, vector<32x64xbf16>, vector<16x64xf32> -> vector<16x64xf32>
    %c0_64 = arith.constant 0 : index
    %c0_65 = arith.constant 0 : index
    %132 = vector.load %arg7[%c0_64, %c0_65] : memref<1x64xf32, #tpu.memory_space<vmem>>, vector<1x64xf32>
    %133 = vector.broadcast %132 : vector<1x64xf32> to vector<16x64xf32>
    %134 = arith.addf %131, %133 : vector<16x64xf32>
    %cst_66 = arith.constant 0.000000e+00 : f32
    %135 = vector.broadcast %cst_66 : f32 to vector<16x64xf32>
    %136 = arith.maximumf %134, %135 : vector<16x64xf32>
    %137 = arith.truncf %136 : vector<16x64xf32> to vector<16x64xbf16>
    %c0_67 = arith.constant 0 : index
    %c0_68 = arith.constant 0 : index
    %138 = vector.load %arg8[%c0_67, %c0_68] : memref<64x32xbf16, #tpu.memory_space<vmem>>, vector<64x32xbf16>
    %cst_69 = arith.constant dense<0.000000e+00> : vector<16x32xf32>
    %139 = tpu.matmul %137, %138, %cst_69 {dimension_numbers = #tpu.dot_dimension_numbers<[1], [0], [0], [1], [0, 0, 1, 1], [], []>} : vector<16x64xbf16>, vector<64x32xbf16>, vector<16x32xf32> -> vector<16x32xf32>
    %c0_70 = arith.constant 0 : index
    %c0_71 = arith.constant 0 : index
    %140 = vector.load %arg9[%c0_70, %c0_71] : memref<1x32xf32, #tpu.memory_space<vmem>>, vector<1x32xf32>
    %141 = vector.broadcast %140 : vector<1x32xf32> to vector<16x32xf32>
    %142 = arith.addf %139, %141 : vector<16x32xf32>
    %143 = arith.addf %128, %142 : vector<16x32xf32>
    %cst_72 = arith.constant dense<0.000000e+00> : vector<16xf32>
    %144 = vector.multi_reduction <add>, %143, %cst_72 [1] : vector<16x32xf32> to vector<16xf32>
    %145 = vector.shape_cast %144 : vector<16xf32> to vector<16x1xf32>
    %cst_73 = arith.constant 3.200000e+01 : f32
    %146 = vector.broadcast %cst_73 : f32 to vector<16x1xf32>
    %147 = arith.divf %145, %146 : vector<16x1xf32>
    %148 = arith.mulf %143, %143 : vector<16x32xf32>
    %cst_74 = arith.constant dense<0.000000e+00> : vector<16xf32>
    %149 = vector.multi_reduction <add>, %148, %cst_74 [1] : vector<16x32xf32> to vector<16xf32>
    %150 = vector.shape_cast %149 : vector<16xf32> to vector<16x1xf32>
    %cst_75 = arith.constant 3.200000e+01 : f32
    %151 = vector.broadcast %cst_75 : f32 to vector<16x1xf32>
    %152 = arith.divf %150, %151 : vector<16x1xf32>
    %153 = arith.mulf %147, %147 : vector<16x1xf32>
    %154 = arith.subf %152, %153 : vector<16x1xf32>
    %155 = vector.broadcast %147 : vector<16x1xf32> to vector<16x32xf32>
    %156 = arith.subf %143, %155 : vector<16x32xf32>
    %cst_76 = arith.constant 9.99999974E-6 : f32
    %157 = vector.broadcast %cst_76 : f32 to vector<16x1xf32>
    %158 = arith.addf %154, %157 : vector<16x1xf32>
    %159 = math.rsqrt %158 : vector<16x1xf32>
    %160 = vector.broadcast %159 : vector<16x1xf32> to vector<16x32xf32>
    %161 = arith.mulf %156, %160 : vector<16x32xf32>
    %c0_77 = arith.constant 0 : index
    %c0_78 = arith.constant 0 : index
    %162 = vector.load %arg12[%c0_77, %c0_78] : memref<1x32xf32, #tpu.memory_space<vmem>>, vector<1x32xf32>
    %163 = vector.broadcast %162 : vector<1x32xf32> to vector<16x32xf32>
    %164 = arith.mulf %161, %163 : vector<16x32xf32>
    %c0_79 = arith.constant 0 : index
    %c0_80 = arith.constant 0 : index
    %165 = vector.load %arg13[%c0_79, %c0_80] : memref<1x32xf32, #tpu.memory_space<vmem>>, vector<1x32xf32>
    %166 = vector.broadcast %165 : vector<1x32xf32> to vector<16x32xf32>
    %167 = arith.addf %164, %166 : vector<16x32xf32>
    %168 = vector.shape_cast %167 : vector<16x32xf32> to vector<2x8x32xf32>
    %c0_81 = arith.constant 0 : index
    %c0_82 = arith.constant 0 : index
    %c0_83 = arith.constant 0 : index
    %169 = vector.load %arg14[%c0_81, %c0_82, %c0_83] : memref<2x8x32xf32, #tpu.memory_space<vmem>>, vector<2x8x32xf32>
    tpu.vector_store %arg14[%c0_81, %c0_82, %c0_83], %168 {strides = array<i32>} : memref<2x8x32xf32, #tpu.memory_space<vmem>>, vector<2x8x32xf32>,
    return
  }
  func.func @transform_0(%arg0: i32) -> (i32, i32, i32) {
    %c0_i32 = arith.constant 0 : i32
    %c0_i32_0 = arith.constant 0 : i32
    %c0_i32_1 = arith.constant 0 : i32
    return %arg0, %c0_i32, %c0_i32_0 : i32, i32, i32
  }
  func.func @transform_1(%arg0: i32) -> (i32, i32) {
    %c0_i32 = arith.constant 0 : i32
    %c0_i32_0 = arith.constant 0 : i32
    %c0_i32_1 = arith.constant 0 : i32
    return %c0_i32, %c0_i32_0 : i32, i32
  }
  func.func @transform_2(%arg0: i32) -> (i32, i32) {
    %c0_i32 = arith.constant 0 : i32
    %c0_i32_0 = arith.constant 0 : i32
    %c0_i32_1 = arith.constant 0 : i32
    return %c0_i32, %c0_i32_0 : i32, i32
  }
  func.func @transform_3(%arg0: i32) -> (i32, i32) {
    %c0_i32 = arith.constant 0 : i32
    %c0_i32_0 = arith.constant 0 : i32
    %c0_i32_1 = arith.constant 0 : i32
    return %c0_i32, %c0_i32_0 : i32, i32
  }
  func.func @transform_4(%arg0: i32) -> (i32, i32) {
    %c0_i32 = arith.constant 0 : i32
    %c0_i32_0 = arith.constant 0 : i32
    %c0_i32_1 = arith.constant 0 : i32
    return %c0_i32, %c0_i32_0 : i32, i32
  }
  func.func @transform_5(%arg0: i32) -> (i32, i32) {
    %c0_i32 = arith.constant 0 : i32
    %c0_i32_0 = arith.constant 0 : i32
    %c0_i32_1 = arith.constant 0 : i32
    return %c0_i32, %c0_i32_0 : i32, i32
  }
  func.func @transform_6(%arg0: i32) -> (i32, i32) {
    %c0_i32 = arith.constant 0 : i32
    %c0_i32_0 = arith.constant 0 : i32
    %c0_i32_1 = arith.constant 0 : i32
    return %c0_i32, %c0_i32_0 : i32, i32
  }
  func.func @transform_7(%arg0: i32) -> (i32, i32) {
    %c0_i32 = arith.constant 0 : i32
    %c0_i32_0 = arith.constant 0 : i32
    %c0_i32_1 = arith.constant 0 : i32
    return %c0_i32, %c0_i32_0 : i32, i32
  }
  func.func @transform_8(%arg0: i32) -> (i32, i32) {
    %c0_i32 = arith.constant 0 : i32
    %c0_i32_0 = arith.constant 0 : i32
    %c0_i32_1 = arith.constant 0 : i32
    return %c0_i32, %c0_i32_0 : i32, i32
  }
  func.func @transform_9(%arg0: i32) -> (i32, i32) {
    %c0_i32 = arith.constant 0 : i32
    %c0_i32_0 = arith.constant 0 : i32
    %c0_i32_1 = arith.constant 0 : i32
    return %c0_i32, %c0_i32_0 : i32, i32
  }
  func.func @transform_10(%arg0: i32) -> (i32, i32) {
    %c0_i32 = arith.constant 0 : i32
    %c0_i32_0 = arith.constant 0 : i32
    %c0_i32_1 = arith.constant 0 : i32
    return %c0_i32, %c0_i32_0 : i32, i32
  }
  func.func @transform_11(%arg0: i32) -> (i32, i32) {
    %c0_i32 = arith.constant 0 : i32
    %c0_i32_0 = arith.constant 0 : i32
    %c0_i32_1 = arith.constant 0 : i32
    return %c0_i32, %c0_i32_0 : i32, i32
  }
  func.func @transform_12(%arg0: i32) -> (i32, i32) {
    %c0_i32 = arith.constant 0 : i32
    %c0_i32_0 = arith.constant 0 : i32
    %c0_i32_1 = arith.constant 0 : i32
    return %c0_i32, %c0_i32_0 : i32, i32
  }
  func.func @transform_13(%arg0: i32) -> (i32, i32, i32) {
    %c0_i32 = arith.constant 0 : i32
    %c0_i32_0 = arith.constant 0 : i32
    %c0_i32_1 = arith.constant 0 : i32
    return %arg0, %c0_i32, %c0_i32_0 : i32, i32, i32
  }
}

module attributes {stable_mosaic.version = 11 : i64} {
  func.func @encoder_layer_kernel(%arg0: i32, %arg1: memref<2x8x32xf32, #tpu.memory_space<vmem>>, %arg2: memref<32x96xbf16, #tpu.memory_space<vmem>>, %arg3: memref<1x96xf32, #tpu.memory_space<vmem>>, %arg4: memref<32x32xbf16, #tpu.memory_space<vmem>>, %arg5: memref<1x32xf32, #tpu.memory_space<vmem>>, %arg6: memref<32x64xbf16, #tpu.memory_space<vmem>>, %arg7: memref<1x64xf32, #tpu.memory_space<vmem>>, %arg8: memref<64x32xbf16, #tpu.memory_space<vmem>>, %arg9: memref<1x32xf32, #tpu.memory_space<vmem>>, %arg10: memref<1x32xf32, #tpu.memory_space<vmem>>, %arg11: memref<1x32xf32, #tpu.memory_space<vmem>>, %arg12: memref<1x32xf32, #tpu.memory_space<vmem>>, %arg13: memref<1x32xf32, #tpu.memory_space<vmem>>, %arg14: memref<2x8x32xf32, #tpu.memory_space<vmem>>, %arg15: memref<16x96xbf16, #tpu.memory_space<vmem>>, %arg16: memref<16x32xbf16, #tpu.memory_space<vmem>>) attributes {dimension_semantics = [#tpu.dimension_semantics<parallel>], iteration_bounds = array<i64: 1>, scalar_prefetch = 0 : i64, scratch_operands = 2 : i64, tpu.core_type = #tpu.core_type<tc>, window_params = [{transform_indices = @transform_0, window_bounds = array<i64: 2, 8, 32>}, {pipeline_mode = #tpu.pipeline_mode<synchronous>, transform_indices = @transform_1, window_bounds = array<i64: 32, 96>}, {pipeline_mode = #tpu.pipeline_mode<synchronous>, transform_indices = @transform_2, window_bounds = array<i64: 1, 96>}, {pipeline_mode = #tpu.pipeline_mode<synchronous>, transform_indices = @transform_3, window_bounds = array<i64: 32, 32>}, {pipeline_mode = #tpu.pipeline_mode<synchronous>, transform_indices = @transform_4, window_bounds = array<i64: 1, 32>}, {pipeline_mode = #tpu.pipeline_mode<synchronous>, transform_indices = @transform_5, window_bounds = array<i64: 32, 64>}, {pipeline_mode = #tpu.pipeline_mode<synchronous>, transform_indices = @transform_6, window_bounds = array<i64: 1, 64>}, {pipeline_mode = #tpu.pipeline_mode<synchronous>, transform_indices = @transform_7, window_bounds = array<i64: 64, 32>}, {pipeline_mode = #tpu.pipeline_mode<synchronous>, transform_indices = @transform_8, window_bounds = array<i64: 1, 32>}, {pipeline_mode = #tpu.pipeline_mode<synchronous>, transform_indices = @transform_9, window_bounds = array<i64: 1, 32>}, {pipeline_mode = #tpu.pipeline_mode<synchronous>, transform_indices = @transform_10, window_bounds = array<i64: 1, 32>}, {pipeline_mode = #tpu.pipeline_mode<synchronous>, transform_indices = @transform_11, window_bounds = array<i64: 1, 32>}, {pipeline_mode = #tpu.pipeline_mode<synchronous>, transform_indices = @transform_12, window_bounds = array<i64: 1, 32>}, {transform_indices = @transform_13, window_bounds = array<i64: 2, 8, 32>}]} {
    %c0 = arith.constant 0 : index
    %c0_0 = arith.constant 0 : index
    %c0_1 = arith.constant 0 : index
    %0 = vector.load %arg1[%c0, %c0_0, %c0_1] : memref<2x8x32xf32, #tpu.memory_space<vmem>>, vector<2x8x32xf32>
    %1 = vector.shape_cast %0 : vector<2x8x32xf32> to vector<16x32xf32>
    %2 = arith.truncf %1 : vector<16x32xf32> to vector<16x32xbf16>
    %c0_2 = arith.constant 0 : index
    %c0_3 = arith.constant 0 : index
    %3 = vector.load %arg2[%c0_2, %c0_3] : memref<32x96xbf16, #tpu.memory_space<vmem>>, vector<32x96xbf16>
    %cst = arith.constant dense<0.000000e+00> : vector<16x96xf32>
    %4 = tpu.matmul %2, %3, %cst {dimension_numbers = #tpu.dot_dimension_numbers<[1], [0], [0], [1], [0, 0, 1, 1], [], []>} : vector<16x32xbf16>, vector<32x96xbf16>, vector<16x96xf32> -> vector<16x96xf32>
    %c0_4 = arith.constant 0 : index
    %c0_5 = arith.constant 0 : index
    %5 = vector.load %arg3[%c0_4, %c0_5] : memref<1x96xf32, #tpu.memory_space<vmem>>, vector<1x96xf32>
    %6 = vector.broadcast %5 : vector<1x96xf32> to vector<16x96xf32>
    %7 = arith.addf %4, %6 : vector<16x96xf32>
    %8 = arith.truncf %7 : vector<16x96xf32> to vector<16x96xbf16>
    %c0_6 = arith.constant 0 : index
    %c0_7 = arith.constant 0 : index
    %9 = vector.load %arg15[%c0_6, %c0_7] : memref<16x96xbf16, #tpu.memory_space<vmem>>, vector<16x96xbf16>
    tpu.vector_store %arg15[%c0_6, %c0_7], %8 {strides = array<i32>} : memref<16x96xbf16, #tpu.memory_space<vmem>>, vector<16x96xbf16>,
    %c0_8 = arith.constant 0 : index
    %c0_9 = arith.constant 0 : index
    %10 = vector.load %arg15[%c0_8, %c0_9] : memref<16x96xbf16, #tpu.memory_space<vmem>>, vector<16x8xbf16>
    %c0_10 = arith.constant 0 : index
    %c32 = arith.constant 32 : index
    %11 = vector.load %arg15[%c0_10, %c32] : memref<16x96xbf16, #tpu.memory_space<vmem>>, vector<16x8xbf16>
    %c0_11 = arith.constant 0 : index
    %c64 = arith.constant 64 : index
    %12 = vector.load %arg15[%c0_11, %c64] : memref<16x96xbf16, #tpu.memory_space<vmem>>, vector<16x8xbf16>
    %13 = vector.shape_cast %10 : vector<16x8xbf16> to vector<2x8x8xbf16>
    %14 = vector.shape_cast %11 : vector<16x8xbf16> to vector<2x8x8xbf16>
    %15 = vector.shape_cast %12 : vector<16x8xbf16> to vector<2x8x8xbf16>
    "tpu.trace_start"() <{level = 10 : i32, message = "bqd,bkd->bqk"}> : () -> ()
    %cst_12 = arith.constant dense<0.000000e+00> : vector<2x8x8xf32>
    %16 = tpu.matmul %13, %14, %cst_12 {dimension_numbers = #tpu.dot_dimension_numbers<[2], [2], [1], [1], [0, 0, 0, 1, 1, 1], [0], [0]>} : vector<2x8x8xbf16>, vector<2x8x8xbf16>, vector<2x8x8xf32> -> vector<2x8x8xf32>
    "tpu.trace_stop"() : () -> ()
    %cst_13 = arith.constant dense<0xFF800000> : vector<2x8xf32>
    %17 = vector.multi_reduction <maximumf>, %16, %cst_13 [2] : vector<2x8x8xf32> to vector<2x8xf32>
    %18 = vector.shape_cast %17 : vector<2x8xf32> to vector<2x8x1xf32>
    %19 = vector.broadcast %18 : vector<2x8x1xf32> to vector<2x8x8xf32>
    %20 = arith.subf %16, %19 : vector<2x8x8xf32>
    %21 = math.exp %20 : vector<2x8x8xf32>
    %cst_14 = arith.constant dense<0.000000e+00> : vector<2x8xf32>
    %22 = vector.multi_reduction <add>, %21, %cst_14 [2] : vector<2x8x8xf32> to vector<2x8xf32>
    %23 = vector.shape_cast %22 : vector<2x8xf32> to vector<2x8x1xf32>
    %24 = tpu.reciprocal %23 {approx = true} : vector<2x8x1xf32> -> vector<2x8x1xf32>
    %25 = vector.broadcast %24 : vector<2x8x1xf32> to vector<2x8x8xf32>
    %26 = arith.mulf %21, %25 : vector<2x8x8xf32>
    %27 = arith.truncf %26 : vector<2x8x8xf32> to vector<2x8x8xbf16>
    "tpu.trace_start"() <{level = 10 : i32, message = "bqk,bkd->bqd"}> : () -> ()
    %cst_15 = arith.constant dense<0.000000e+00> : vector<2x8x8xf32>
    %28 = tpu.matmul %27, %15, %cst_15 {dimension_numbers = #tpu.dot_dimension_numbers<[2], [1], [1], [2], [0, 0, 0, 1, 1, 2], [0], [0]>} : vector<2x8x8xbf16>, vector<2x8x8xbf16>, vector<2x8x8xf32> -> vector<2x8x8xf32>
    "tpu.trace_stop"() : () -> ()
    %29 = vector.shape_cast %28 : vector<2x8x8xf32> to vector<16x8xf32>
    %30 = arith.truncf %29 : vector<16x8xf32> to vector<16x8xbf16>
    %c0_16 = arith.constant 0 : index
    %c0_17 = arith.constant 0 : index
    %31 = vector.load %arg16[%c0_16, %c0_17] : memref<16x32xbf16, #tpu.memory_space<vmem>>, vector<16x8xbf16>
    tpu.vector_store %arg16[%c0_16, %c0_17], %30 {strides = array<i32>} : memref<16x32xbf16, #tpu.memory_space<vmem>>, vector<16x8xbf16>,
    %c0_18 = arith.constant 0 : index
    %c8 = arith.constant 8 : index
    %32 = vector.load %arg15[%c0_18, %c8] : memref<16x96xbf16, #tpu.memory_space<vmem>>, vector<16x8xbf16>
    %c0_19 = arith.constant 0 : index
    %c40 = arith.constant 40 : index
    %33 = vector.load %arg15[%c0_19, %c40] : memref<16x96xbf16, #tpu.memory_space<vmem>>, vector<16x8xbf16>
    %c0_20 = arith.constant 0 : index
    %c72 = arith.constant 72 : index
    %34 = vector.load %arg15[%c0_20, %c72] : memref<16x96xbf16, #tpu.memory_space<vmem>>, vector<16x8xbf16>
    %35 = vector.shape_cast %32 : vector<16x8xbf16> to vector<2x8x8xbf16>
    %36 = vector.shape_cast %33 : vector<16x8xbf16> to vector<2x8x8xbf16>
    %37 = vector.shape_cast %34 : vector<16x8xbf16> to vector<2x8x8xbf16>
    "tpu.trace_start"() <{level = 10 : i32, message = "bqd,bkd->bqk"}> : () -> ()
    %cst_21 = arith.constant dense<0.000000e+00> : vector<2x8x8xf32>
    %38 = tpu.matmul %35, %36, %cst_21 {dimension_numbers = #tpu.dot_dimension_numbers<[2], [2], [1], [1], [0, 0, 0, 1, 1, 1], [0], [0]>} : vector<2x8x8xbf16>, vector<2x8x8xbf16>, vector<2x8x8xf32> -> vector<2x8x8xf32>
    "tpu.trace_stop"() : () -> ()
    %cst_22 = arith.constant dense<0xFF800000> : vector<2x8xf32>
    %39 = vector.multi_reduction <maximumf>, %38, %cst_22 [2] : vector<2x8x8xf32> to vector<2x8xf32>
    %40 = vector.shape_cast %39 : vector<2x8xf32> to vector<2x8x1xf32>
    %41 = vector.broadcast %40 : vector<2x8x1xf32> to vector<2x8x8xf32>
    %42 = arith.subf %38, %41 : vector<2x8x8xf32>
    %43 = math.exp %42 : vector<2x8x8xf32>
    %cst_23 = arith.constant dense<0.000000e+00> : vector<2x8xf32>
    %44 = vector.multi_reduction <add>, %43, %cst_23 [2] : vector<2x8x8xf32> to vector<2x8xf32>
    %45 = vector.shape_cast %44 : vector<2x8xf32> to vector<2x8x1xf32>
    %46 = tpu.reciprocal %45 {approx = true} : vector<2x8x1xf32> -> vector<2x8x1xf32>
    %47 = vector.broadcast %46 : vector<2x8x1xf32> to vector<2x8x8xf32>
    %48 = arith.mulf %43, %47 : vector<2x8x8xf32>
    %49 = arith.truncf %48 : vector<2x8x8xf32> to vector<2x8x8xbf16>
    "tpu.trace_start"() <{level = 10 : i32, message = "bqk,bkd->bqd"}> : () -> ()
    %cst_24 = arith.constant dense<0.000000e+00> : vector<2x8x8xf32>
    %50 = tpu.matmul %49, %37, %cst_24 {dimension_numbers = #tpu.dot_dimension_numbers<[2], [1], [1], [2], [0, 0, 0, 1, 1, 2], [0], [0]>} : vector<2x8x8xbf16>, vector<2x8x8xbf16>, vector<2x8x8xf32> -> vector<2x8x8xf32>
    "tpu.trace_stop"() : () -> ()
    %51 = vector.shape_cast %50 : vector<2x8x8xf32> to vector<16x8xf32>
    %52 = arith.truncf %51 : vector<16x8xf32> to vector<16x8xbf16>
    %c0_25 = arith.constant 0 : index
    %c8_26 = arith.constant 8 : index
    %53 = vector.load %arg16[%c0_25, %c8_26] : memref<16x32xbf16, #tpu.memory_space<vmem>>, vector<16x8xbf16>
    tpu.vector_store %arg16[%c0_25, %c8_26], %52 {strides = array<i32>} : memref<16x32xbf16, #tpu.memory_space<vmem>>, vector<16x8xbf16>,
    %c0_27 = arith.constant 0 : index
    %c16 = arith.constant 16 : index
    %54 = vector.load %arg15[%c0_27, %c16] : memref<16x96xbf16, #tpu.memory_space<vmem>>, vector<16x8xbf16>
    %c0_28 = arith.constant 0 : index
    %c48 = arith.constant 48 : index
    %55 = vector.load %arg15[%c0_28, %c48] : memref<16x96xbf16, #tpu.memory_space<vmem>>, vector<16x8xbf16>
    %c0_29 = arith.constant 0 : index
    %c80 = arith.constant 80 : index
    %56 = vector.load %arg15[%c0_29, %c80] : memref<16x96xbf16, #tpu.memory_space<vmem>>, vector<16x8xbf16>
    %57 = vector.shape_cast %54 : vector<16x8xbf16> to vector<2x8x8xbf16>
    %58 = vector.shape_cast %55 : vector<16x8xbf16> to vector<2x8x8xbf16>
    %59 = vector.shape_cast %56 : vector<16x8xbf16> to vector<2x8x8xbf16>
    "tpu.trace_start"() <{level = 10 : i32, message = "bqd,bkd->bqk"}> : () -> ()
    %cst_30 = arith.constant dense<0.000000e+00> : vector<2x8x8xf32>
    %60 = tpu.matmul %57, %58, %cst_30 {dimension_numbers = #tpu.dot_dimension_numbers<[2], [2], [1], [1], [0, 0, 0, 1, 1, 1], [0], [0]>} : vector<2x8x8xbf16>, vector<2x8x8xbf16>, vector<2x8x8xf32> -> vector<2x8x8xf32>
    "tpu.trace_stop"() : () -> ()
    %cst_31 = arith.constant dense<0xFF800000> : vector<2x8xf32>
    %61 = vector.multi_reduction <maximumf>, %60, %cst_31 [2] : vector<2x8x8xf32> to vector<2x8xf32>
    %62 = vector.shape_cast %61 : vector<2x8xf32> to vector<2x8x1xf32>
    %63 = vector.broadcast %62 : vector<2x8x1xf32> to vector<2x8x8xf32>
    %64 = arith.subf %60, %63 : vector<2x8x8xf32>
    %65 = math.exp %64 : vector<2x8x8xf32>
    %cst_32 = arith.constant dense<0.000000e+00> : vector<2x8xf32>
    %66 = vector.multi_reduction <add>, %65, %cst_32 [2] : vector<2x8x8xf32> to vector<2x8xf32>
    %67 = vector.shape_cast %66 : vector<2x8xf32> to vector<2x8x1xf32>
    %68 = tpu.reciprocal %67 {approx = true} : vector<2x8x1xf32> -> vector<2x8x1xf32>
    %69 = vector.broadcast %68 : vector<2x8x1xf32> to vector<2x8x8xf32>
    %70 = arith.mulf %65, %69 : vector<2x8x8xf32>
    %71 = arith.truncf %70 : vector<2x8x8xf32> to vector<2x8x8xbf16>
    "tpu.trace_start"() <{level = 10 : i32, message = "bqk,bkd->bqd"}> : () -> ()
    %cst_33 = arith.constant dense<0.000000e+00> : vector<2x8x8xf32>
    %72 = tpu.matmul %71, %59, %cst_33 {dimension_numbers = #tpu.dot_dimension_numbers<[2], [1], [1], [2], [0, 0, 0, 1, 1, 2], [0], [0]>} : vector<2x8x8xbf16>, vector<2x8x8xbf16>, vector<2x8x8xf32> -> vector<2x8x8xf32>
    "tpu.trace_stop"() : () -> ()
    %73 = vector.shape_cast %72 : vector<2x8x8xf32> to vector<16x8xf32>
    %74 = arith.truncf %73 : vector<16x8xf32> to vector<16x8xbf16>
    %c0_34 = arith.constant 0 : index
    %c16_35 = arith.constant 16 : index
    %75 = vector.load %arg16[%c0_34, %c16_35] : memref<16x32xbf16, #tpu.memory_space<vmem>>, vector<16x8xbf16>
    tpu.vector_store %arg16[%c0_34, %c16_35], %74 {strides = array<i32>} : memref<16x32xbf16, #tpu.memory_space<vmem>>, vector<16x8xbf16>,
    %c0_36 = arith.constant 0 : index
    %c24 = arith.constant 24 : index
    %76 = vector.load %arg15[%c0_36, %c24] : memref<16x96xbf16, #tpu.memory_space<vmem>>, vector<16x8xbf16>
    %c0_37 = arith.constant 0 : index
    %c56 = arith.constant 56 : index
    %77 = vector.load %arg15[%c0_37, %c56] : memref<16x96xbf16, #tpu.memory_space<vmem>>, vector<16x8xbf16>
    %c0_38 = arith.constant 0 : index
    %c88 = arith.constant 88 : index
    %78 = vector.load %arg15[%c0_38, %c88] : memref<16x96xbf16, #tpu.memory_space<vmem>>, vector<16x8xbf16>
    %79 = vector.shape_cast %76 : vector<16x8xbf16> to vector<2x8x8xbf16>
    %80 = vector.shape_cast %77 : vector<16x8xbf16> to vector<2x8x8xbf16>
    %81 = vector.shape_cast %78 : vector<16x8xbf16> to vector<2x8x8xbf16>
    "tpu.trace_start"() <{level = 10 : i32, message = "bqd,bkd->bqk"}> : () -> ()
    %cst_39 = arith.constant dense<0.000000e+00> : vector<2x8x8xf32>
    %82 = tpu.matmul %79, %80, %cst_39 {dimension_numbers = #tpu.dot_dimension_numbers<[2], [2], [1], [1], [0, 0, 0, 1, 1, 1], [0], [0]>} : vector<2x8x8xbf16>, vector<2x8x8xbf16>, vector<2x8x8xf32> -> vector<2x8x8xf32>
    "tpu.trace_stop"() : () -> ()
    %cst_40 = arith.constant dense<0xFF800000> : vector<2x8xf32>
    %83 = vector.multi_reduction <maximumf>, %82, %cst_40 [2] : vector<2x8x8xf32> to vector<2x8xf32>
    %84 = vector.shape_cast %83 : vector<2x8xf32> to vector<2x8x1xf32>
    %85 = vector.broadcast %84 : vector<2x8x1xf32> to vector<2x8x8xf32>
    %86 = arith.subf %82, %85 : vector<2x8x8xf32>
    %87 = math.exp %86 : vector<2x8x8xf32>
    %cst_41 = arith.constant dense<0.000000e+00> : vector<2x8xf32>
    %88 = vector.multi_reduction <add>, %87, %cst_41 [2] : vector<2x8x8xf32> to vector<2x8xf32>
    %89 = vector.shape_cast %88 : vector<2x8xf32> to vector<2x8x1xf32>
    %90 = tpu.reciprocal %89 {approx = true} : vector<2x8x1xf32> -> vector<2x8x1xf32>
    %91 = vector.broadcast %90 : vector<2x8x1xf32> to vector<2x8x8xf32>
    %92 = arith.mulf %87, %91 : vector<2x8x8xf32>
    %93 = arith.truncf %92 : vector<2x8x8xf32> to vector<2x8x8xbf16>
    "tpu.trace_start"() <{level = 10 : i32, message = "bqk,bkd->bqd"}> : () -> ()
    %cst_42 = arith.constant dense<0.000000e+00> : vector<2x8x8xf32>
    %94 = tpu.matmul %93, %81, %cst_42 {dimension_numbers = #tpu.dot_dimension_numbers<[2], [1], [1], [2], [0, 0, 0, 1, 1, 2], [0], [0]>} : vector<2x8x8xbf16>, vector<2x8x8xbf16>, vector<2x8x8xf32> -> vector<2x8x8xf32>
    "tpu.trace_stop"() : () -> ()
    %95 = vector.shape_cast %94 : vector<2x8x8xf32> to vector<16x8xf32>
    %96 = arith.truncf %95 : vector<16x8xf32> to vector<16x8xbf16>
    %c0_43 = arith.constant 0 : index
    %c24_44 = arith.constant 24 : index
    %97 = vector.load %arg16[%c0_43, %c24_44] : memref<16x32xbf16, #tpu.memory_space<vmem>>, vector<16x8xbf16>
    tpu.vector_store %arg16[%c0_43, %c24_44], %96 {strides = array<i32>} : memref<16x32xbf16, #tpu.memory_space<vmem>>, vector<16x8xbf16>,
    %c0_45 = arith.constant 0 : index
    %c0_46 = arith.constant 0 : index
    %98 = vector.load %arg16[%c0_45, %c0_46] : memref<16x32xbf16, #tpu.memory_space<vmem>>, vector<16x32xbf16>
    %c0_47 = arith.constant 0 : index
    %c0_48 = arith.constant 0 : index
    %99 = vector.load %arg4[%c0_47, %c0_48] : memref<32x32xbf16, #tpu.memory_space<vmem>>, vector<32x32xbf16>
    %cst_49 = arith.constant dense<0.000000e+00> : vector<16x32xf32>
    %100 = tpu.matmul %98, %99, %cst_49 {dimension_numbers = #tpu.dot_dimension_numbers<[1], [0], [0], [1], [0, 0, 1, 1], [], []>} : vector<16x32xbf16>, vector<32x32xbf16>, vector<16x32xf32> -> vector<16x32xf32>
    %c0_50 = arith.constant 0 : index
    %c0_51 = arith.constant 0 : index
    %101 = vector.load %arg5[%c0_50, %c0_51] : memref<1x32xf32, #tpu.memory_space<vmem>>, vector<1x32xf32>
    %102 = vector.broadcast %101 : vector<1x32xf32> to vector<16x32xf32>
    %103 = arith.addf %100, %102 : vector<16x32xf32>
    %104 = arith.addf %1, %103 : vector<16x32xf32>
    %cst_52 = arith.constant dense<0.000000e+00> : vector<16xf32>
    %105 = vector.multi_reduction <add>, %104, %cst_52 [1] : vector<16x32xf32> to vector<16xf32>
    %106 = vector.shape_cast %105 : vector<16xf32> to vector<16x1xf32>
    %cst_53 = arith.constant 3.200000e+01 : f32
    %107 = vector.broadcast %cst_53 : f32 to vector<16x1xf32>
    %108 = arith.divf %106, %107 : vector<16x1xf32>
    %109 = arith.mulf %104, %104 : vector<16x32xf32>
    %cst_54 = arith.constant dense<0.000000e+00> : vector<16xf32>
    %110 = vector.multi_reduction <add>, %109, %cst_54 [1] : vector<16x32xf32> to vector<16xf32>
    %111 = vector.shape_cast %110 : vector<16xf32> to vector<16x1xf32>
    %cst_55 = arith.constant 3.200000e+01 : f32
    %112 = vector.broadcast %cst_55 : f32 to vector<16x1xf32>
    %113 = arith.divf %111, %112 : vector<16x1xf32>
    %114 = arith.mulf %108, %108 : vector<16x1xf32>
    %115 = arith.subf %113, %114 : vector<16x1xf32>
    %116 = vector.broadcast %108 : vector<16x1xf32> to vector<16x32xf32>
    %117 = arith.subf %104, %116 : vector<16x32xf32>
    %cst_56 = arith.constant 9.99999974E-6 : f32
    %118 = vector.broadcast %cst_56 : f32 to vector<16x1xf32>
    %119 = arith.addf %115, %118 : vector<16x1xf32>
    %120 = math.rsqrt %119 : vector<16x1xf32>
    %121 = vector.broadcast %120 : vector<16x1xf32> to vector<16x32xf32>
    %122 = arith.mulf %117, %121 : vector<16x32xf32>
    %c0_57 = arith.constant 0 : index
    %c0_58 = arith.constant 0 : index
    %123 = vector.load %arg10[%c0_57, %c0_58] : memref<1x32xf32, #tpu.memory_space<vmem>>, vector<1x32xf32>
    %124 = vector.broadcast %123 : vector<1x32xf32> to vector<16x32xf32>
    %125 = arith.mulf %122, %124 : vector<16x32xf32>
    %c0_59 = arith.constant 0 : index
    %c0_60 = arith.constant 0 : index
    %126 = vector.load %arg11[%c0_59, %c0_60] : memref<1x32xf32, #tpu.memory_space<vmem>>, vector<1x32xf32>
    %127 = vector.broadcast %126 : vector<1x32xf32> to vector<16x32xf32>
    %128 = arith.addf %125, %127 : vector<16x32xf32>
    %129 = arith.truncf %128 : vector<16x32xf32> to vector<16x32xbf16>
    %c0_61 = arith.constant 0 : index
    %c0_62 = arith.constant 0 : index
    %130 = vector.load %arg6[%c0_61, %c0_62] : memref<32x64xbf16, #tpu.memory_space<vmem>>, vector<32x64xbf16>
    %cst_63 = arith.constant dense<0.000000e+00> : vector<16x64xf32>
    %131 = tpu.matmul %129, %130, %cst_63 {dimension_numbers = #tpu.dot_dimension_numbers<[1], [0], [0], [1], [0, 0, 1, 1], [], []>} : vector<16x32xbf16>, vector<32x64xbf16>, vector<16x64xf32> -> vector<16x64xf32>
    %c0_64 = arith.constant 0 : index
    %c0_65 = arith.constant 0 : index
    %132 = vector.load %arg7[%c0_64, %c0_65] : memref<1x64xf32, #tpu.memory_space<vmem>>, vector<1x64xf32>
    %133 = vector.broadcast %132 : vector<1x64xf32> to vector<16x64xf32>
    %134 = arith.addf %131, %133 : vector<16x64xf32>
    %cst_66 = arith.constant 0.000000e+00 : f32
    %135 = vector.broadcast %cst_66 : f32 to vector<16x64xf32>
    %136 = arith.maximumf %134, %135 : vector<16x64xf32>
    %137 = arith.truncf %136 : vector<16x64xf32> to vector<16x64xbf16>
    %c0_67 = arith.constant 0 : index
    %c0_68 = arith.constant 0 : index
    %138 = vector.load %arg8[%c0_67, %c0_68] : memref<64x32xbf16, #tpu.memory_space<vmem>>, vector<64x32xbf16>
    %cst_69 = arith.constant dense<0.000000e+00> : vector<16x32xf32>
    %139 = tpu.matmul %137, %138, %cst_69 {dimension_numbers = #tpu.dot_dimension_numbers<[1], [0], [0], [1], [0, 0, 1, 1], [], []>} : vector<16x64xbf16>, vector<64x32xbf16>, vector<16x32xf32> -> vector<16x32xf32>
    %c0_70 = arith.constant 0 : index
    %c0_71 = arith.constant 0 : index
    %140 = vector.load %arg9[%c0_70, %c0_71] : memref<1x32xf32, #tpu.memory_space<vmem>>, vector<1x32xf32>
    %141 = vector.broadcast %140 : vector<1x32xf32> to vector<16x32xf32>
    %142 = arith.addf %139, %141 : vector<16x32xf32>
    %143 = arith.addf %128, %142 : vector<16x32xf32>
    %cst_72 = arith.constant dense<0.000000e+00> : vector<16xf32>
    %144 = vector.multi_reduction <add>, %143, %cst_72 [1] : vector<16x32xf32> to vector<16xf32>
    %145 = vector.shape_cast %144 : vector<16xf32> to vector<16x1xf32>
    %cst_73 = arith.constant 3.200000e+01 : f32
    %146 = vector.broadcast %cst_73 : f32 to vector<16x1xf32>
    %147 = arith.divf %145, %146 : vector<16x1xf32>
    %148 = arith.mulf %143, %143 : vector<16x32xf32>
    %cst_74 = arith.constant dense<0.000000e+00> : vector<16xf32>
    %149 = vector.multi_reduction <add>, %148, %cst_74 [1] : vector<16x32xf32> to vector<16xf32>
    %150 = vector.shape_cast %149 : vector<16xf32> to vector<16x1xf32>
    %cst_75 = arith.constant 3.200000e+01 : f32
    %151 = vector.broadcast %cst_75 : f32 to vector<16x1xf32>
    %152 = arith.divf %150, %151 : vector<16x1xf32>
    %153 = arith.mulf %147, %147 : vector<16x1xf32>
    %154 = arith.subf %152, %153 : vector<16x1xf32>
    %155 = vector.broadcast %147 : vector<16x1xf32> to vector<16x32xf32>
    %156 = arith.subf %143, %155 : vector<16x32xf32>
    %cst_76 = arith.constant 9.99999974E-6 : f32
    %157 = vector.broadcast %cst_76 : f32 to vector<16x1xf32>
    %158 = arith.addf %154, %157 : vector<16x1xf32>
    %159 = math.rsqrt %158 : vector<16x1xf32>
    %160 = vector.broadcast %159 : vector<16x1xf32> to vector<16x32xf32>
    %161 = arith.mulf %156, %160 : vector<16x32xf32>
    %c0_77 = arith.constant 0 : index
    %c0_78 = arith.constant 0 : index
    %162 = vector.load %arg12[%c0_77, %c0_78] : memref<1x32xf32, #tpu.memory_space<vmem>>, vector<1x32xf32>
    %163 = vector.broadcast %162 : vector<1x32xf32> to vector<16x32xf32>
    %164 = arith.mulf %161, %163 : vector<16x32xf32>
    %c0_79 = arith.constant 0 : index
    %c0_80 = arith.constant 0 : index
    %165 = vector.load %arg13[%c0_79, %c0_80] : memref<1x32xf32, #tpu.memory_space<vmem>>, vector<1x32xf32>
    %166 = vector.broadcast %165 : vector<1x32xf32> to vector<16x32xf32>
    %167 = arith.addf %164, %166 : vector<16x32xf32>
    %168 = vector.shape_cast %167 : vector<16x32xf32> to vector<2x8x32xf32>
    %c0_81 = arith.constant 0 : index
    %c0_82 = arith.constant 0 : index
    %c0_83 = arith.constant 0 : index
    %169 = vector.load %arg14[%c0_81, %c0_82, %c0_83] : memref<2x8x32xf32, #tpu.memory_space<vmem>>, vector<2x8x32xf32>
    tpu.vector_store %arg14[%c0_81, %c0_82, %c0_83], %168 {strides = array<i32>} : memref<2x8x32xf32, #tpu.memory_space<vmem>>, vector<2x8x32xf32>,
    return
  }
  func.func @transform_0(%arg0: i32) -> (i32, i32, i32) {
    %c0_i32 = arith.constant 0 : i32
    %c0_i32_0 = arith.constant 0 : i32
    %c0_i32_1 = arith.constant 0 : i32
    return %arg0, %c0_i32, %c0_i32_0 : i32, i32, i32
  }
  func.func @transform_1(%arg0: i32) -> (i32, i32) {
    %c0_i32 = arith.constant 0 : i32
    %c0_i32_0 = arith.constant 0 : i32
    %c0_i32_1 = arith.constant 0 : i32
    return %c0_i32, %c0_i32_0 : i32, i32
  }
  func.func @transform_2(%arg0: i32) -> (i32, i32) {
    %c0_i32 = arith.constant 0 : i32
    %c0_i32_0 = arith.constant 0 : i32
    %c0_i32_1 = arith.constant 0 : i32
    return %c0_i32, %c0_i32_0 : i32, i32
  }
  func.func @transform_3(%arg0: i32) -> (i32, i32) {
    %c0_i32 = arith.constant 0 : i32
    %c0_i32_0 = arith.constant 0 : i32
    %c0_i32_1 = arith.constant 0 : i32
    return %c0_i32, %c0_i32_0 : i32, i32
  }
  func.func @transform_4(%arg0: i32) -> (i32, i32) {
    %c0_i32 = arith.constant 0 : i32
    %c0_i32_0 = arith.constant 0 : i32
    %c0_i32_1 = arith.constant 0 : i32
    return %c0_i32, %c0_i32_0 : i32, i32
  }
  func.func @transform_5(%arg0: i32) -> (i32, i32) {
    %c0_i32 = arith.constant 0 : i32
    %c0_i32_0 = arith.constant 0 : i32
    %c0_i32_1 = arith.constant 0 : i32
    return %c0_i32, %c0_i32_0 : i32, i32
  }
  func.func @transform_6(%arg0: i32) -> (i32, i32) {
    %c0_i32 = arith.constant 0 : i32
    %c0_i32_0 = arith.constant 0 : i32
    %c0_i32_1 = arith.constant 0 : i32
    return %c0_i32, %c0_i32_0 : i32, i32
  }
  func.func @transform_7(%arg0: i32) -> (i32, i32) {
    %c0_i32 = arith.constant 0 : i32
    %c0_i32_0 = arith.constant 0 : i32
    %c0_i32_1 = arith.constant 0 : i32
    return %c0_i32, %c0_i32_0 : i32, i32
  }
  func.func @transform_8(%arg0: i32) -> (i32, i32) {
    %c0_i32 = arith.constant 0 : i32
    %c0_i32_0 = arith.constant 0 : i32
    %c0_i32_1 = arith.constant 0 : i32
    return %c0_i32, %c0_i32_0 : i32, i32
  }
  func.func @transform_9(%arg0: i32) -> (i32, i32) {
    %c0_i32 = arith.constant 0 : i32
    %c0_i32_0 = arith.constant 0 : i32
    %c0_i32_1 = arith.constant 0 : i32
    return %c0_i32, %c0_i32_0 : i32, i32
  }
  func.func @transform_10(%arg0: i32) -> (i32, i32) {
    %c0_i32 = arith.constant 0 : i32
    %c0_i32_0 = arith.constant 0 : i32
    %c0_i32_1 = arith.constant 0 : i32
    return %c0_i32, %c0_i32_0 : i32, i32
  }
  func.func @transform_11(%arg0: i32) -> (i32, i32) {
    %c0_i32 = arith.constant 0 : i32
    %c0_i32_0 = arith.constant 0 : i32
    %c0_i32_1 = arith.constant 0 : i32
    return %c0_i32, %c0_i32_0 : i32, i32
  }
  func.func @transform_12(%arg0: i32) -> (i32, i32) {
    %c0_i32 = arith.constant 0 : i32
    %c0_i32_0 = arith.constant 0 : i32
    %c0_i32_1 = arith.constant 0 : i32
    return %c0_i32, %c0_i32_0 : i32, i32
  }
  func.func @transform_13(%arg0: i32) -> (i32, i32, i32) {
    %c0_i32 = arith.constant 0 : i32
    %c0_i32_0 = arith.constant 0 : i32
    %c0_i32_1 = arith.constant 0 : i32
    return %arg0, %c0_i32, %c0_i32_0 : i32, i32, i32
  }
}

</mosaic_0001>

<bundles_post_ra>
// kernel: tpu_custom_call.1
= control target key start
LH: loop header
LB: loop body
LE: loop exit
PB: predicated region body
PF: predicated region fallthrough
CT: control target
= control target key end

     0   :  { %18 = vsyncpa [#allocation5], 0  ;;  %s2093_s0 = inlined_call_operand.vmem [shape: f32[2,8,32], index: 0, kind: input, shape index: {}]   ;;  %s2094_s1 = inlined_call_operand.vmem [shape: bf16[32,96], index: 1, kind: input, shape index: {}]   ;;  %s2095_s2 = inlined_call_operand.vmem [shape: f32[1,96], index: 2, kind: input, shape index: {}]   ;;  %s2096_s3 = inlined_call_operand.vmem [shape: bf16[32,32], index: 3, kind: input, shape index: {}]   ;;  %s2097_s4 = inlined_call_operand.vmem [shape: f32[1,32], index: 4, kind: input, shape index: {}]   ;;  %s2098_s5 = inlined_call_operand.hbm [shape: bf16[32,64], index: 5, kind: input, shape index: {}]   ;;  %s2099_s6 = inlined_call_operand.vmem [shape: f32[1,64], index: 6, kind: input, shape index: {}]   ;;  %s2100_s7 = inlined_call_operand.vmem [shape: bf16[64,32], index: 7, kind: input, shape index: {}]   ;;  %s2101_s8 = inlined_call_operand.vmem [shape: f32[1,32], index: 8, kind: input, shape index: {}]   ;;  %s2102_s9 = inlined_call_operand.vmem [shape: f32[1,32], index: 9, kind: input, shape index: {}]   ;;  %s2103_s10 = inlined_call_operand.vmem [shape: f32[1,32], index: 10, kind: input, shape index: {}]   ;;  %s2104_s11 = inlined_call_operand.vmem [shape: f32[1,32], index: 11, kind: input, shape index: {}]   ;;  %s2105_s12 = inlined_call_operand.vmem [shape: f32[1,32], index: 12, kind: input, shape index: {}]   ;;  %s2106_s13 = inlined_call_operand.hbm [shape: f32[2,8,32], index: 13, kind: output, shape index: {}]  }
   0x1   :  { %19 = vsyncpa [#allocation6], 0  ;;  %s1746_s25 = smov [#allocation4]   ;;  %s1698_s29 = scalar_lea.hbm %s2098_s5, 256 }
   0x2   :  { %s35_s26 = sshll.u32 %s1746_s25, 4  ;;  %p1699_p0 = scmp.ne.s32.totalorder %s2098_s5, %s1698_s29  ;;  %s36_s26 = int_to_ptr.vmem [resolvable:$true] %s35_s26 }
   0x3   :  { %p1702_p1 = scmp.lt.u32.totalorder %s1698_s29, %s2098_s5 }
   0x5   :  { %p1704_p2 = pnand %p1702_p1, %p1699_p0 }
   0x7   :  { %1707 = shalt.err (!%p1704_p2)
}
   0x8   :  { %s1708_s17 = scalar_lea.vmem %s36_s26, 256  ;;  %p1713_p4 = scmp.lt.s32.totalorder %s36_s26, %s36_s26 }
   0x9   :  { %p1709_p3 = scmp.ne.s32.totalorder %s36_s26, %s1708_s17  ;;  %p1714_p5 = scmp.lt.s32.totalorder %s1708_s17, %s1708_s17 }
   0xb   :  { %p1715_p6 = por %p1714_p5, %p1713_p4 }
   0xd   :  { %p1716_p7 = pnand %p1715_p6, %p1709_p3 }
   0xf   :  { %1719 = shalt.err (!%p1716_p7)
}
  0x10   :  { %s1747_s18 = smov 64   ;;  %s1748_s19 = smov 4  }
  0x11   :  { %41 = dma.hbm_to_vmem [thread:$0]  %s2098_s5, 256, %s36_s26, [#allocation5], %s1747_s18, %s1747_s18, %s1748_s19  }
  0x12   :  { %1742 = dma.done.wait [#allocation5], 256  }
  0x13   :  { %1743 = vsyncadd [#allocation5], 4294967040  ;;  %v1749_v0 = vmov 0.0   ;;  %vm1750_vm0 = vmmov 0   ;;  %v1646_v1 = vld [vmem:[%s2094_s1] sm:$0xff]   ;;  %v1647_v2 = vld [vmem:[%s2094_s1 + $0x8] sm:$0xff]  }
  0x14   :  { %1494 = vmatprep.subr.bf16.mxu0 %v1749_v0  ;;  %1498 = vmatprep.mubr.msk.bf16.mxu0 %vm1750_vm0, %v1749_v0  ;;  %v1865_v3 = vld [vmem:[%s2093_s0] sm:$0xff]  ;;  %v1870_v4 = vld [vmem:[%s2093_s0 + $0x8] sm:$0xff]  ;;  %vm86_vm1 = vcmask 261120   ;;  %vm132_vm2 = vcmask 785408   ;;  %s1751_s0 = smov 96   ;;  %vm142_vm3 = vcmask 64512  }
  0x15   :  { %1502 = vmatprep.subr.bf16.mxu1 %v1749_v0  ;;  %1504 = vmatprep.mubr.msk.bf16.mxu1 %vm1750_vm0, %v1749_v0  ;;  %v62_v5 = vpack.c.bf16 %v1870_v4, %v1865_v3  ;;  %v1402_v6 = vld [vmem:[%s2095_s2] ss:$0 sm:$0xff]  ;;  %s1752_s2 = smov 88   ;;  %vm266_vm4 = vcmask 1043456   ;;  %s1753_s30 = smov 120   ;;  %vm591_vm5 = vcmask 130112  }
  0x16   :  { %1495 = vmatpush3.bf16.msra.mxu0 %v1646_v1  ;;  %s1754_s14 = smov 56   ;;  %s1755_s15 = smov 80   ;;  %vm824_vm6 = vcmask 195712   ;;  %vm1057_vm7 = vcmask 261312   ;;  %vm1288_vm8 = vcmask 523264  }
  0x17   :  { %1496 = vmatprep.subr.bf16.mxu0 %v1749_v0  ;;  %s1756_s16 = smov 112   ;;  %s1757_s17 = smov 48  }
  0x18   :  { %s1759_s19 = smov 104   ;;  %s1760_s20 = smov 40  }
  0x19   :  { %s1761_s21 = smov 8   ;;  %s1762_s22 = smov 16  }
  0x1a   :  { %1497 = vmatpush3.bf16.msra.mxu0 %v1647_v2  ;;  %s1763_s26 = smov 24   ;;  %s1764_s23 = smov [#allocation7]  }
  0x1b   :  { %1508 = vmatprep.subr.bf16.mxu0 %v1749_v0  ;;  %s1390_s5 = sshll.u32 %s1764_s23, 4  ;;  %s1391_s5 = int_to_ptr.vmem [resolvable:$true] %s1390_s5 }
  0x1c   :  { %p1725_p9 = scmp.lt.s32.totalorder %s1391_s5, %s1391_s5 }
  0x1d   :  { %1499 = vmatmul.mubr.msk.bf16.vlgmr.msra.gmra.mrb[0].mxu0 %vm86_vm1, %v62_v5 }
  0x1e   :  { %1510 = vmatprep.mubr.msk.bf16.mxu0 %vm1750_vm0, %v1749_v0 }
  0xf0   :  { %v124_v7 = vpop.f32.mrb[0].mxu0 }
  0xf1   :  { %v1500_v8 = vpop.f32.mrb[1].mxu0  ;;  %v125_v10 = vadd.f32 %v1402_v6, %v124_v7 }
  0xf2   :  { %v127_v9 = vpop.f32.mrb[2].mxu0 }
  0xf3   :  { %v128_v11 = vadd.f32 %v1402_v6, %v127_v9  ;;  %v1501_v12 = vpop.f32.mrb[3].mxu0 }
  0xf5   :  { %v131_v13 = vpack.c.bf16 %v128_v11, %v125_v10 }
  0xf7   :  { %133 = vst.msk [vmem:[#allocation2] sm:$0xff] %vm132_vm2, %v131_v13 }
  0xfe   :  { %v134_v14 = vld [vmem:[#allocation2] sm:$0xff] }
  0xff   :  { %v1882_v15 = vcombine.low %v134_v14, %v134_v14  ;;  %v1885_v16 = vcombine.high %v134_v14, %v134_v14 }
 0x101   :  { %140 = vrot.lane.b32.xlu0 %v1882_v15, %s1751_s0 }
 0x105   :  { %189 = vrot.lane.b32.xlu0 %v1885_v16, %s1751_s0 }
 0x173   :  { %v141_v17 = vpop.permute.xlu0 %140 }
 0x174   :  { %v147_v18 = vsel %vm142_vm3, %v141_v17, 0 }
 0x175   :  { %1503 = vmatpush3.bf16.xpose.msra.mxu1 %v147_v18 }
 0x176   :  { %1514 = vmatprep.subr.bf16.mxu1 %v1749_v0 }
 0x177   :  { %v190_v19 = vpop.permute.xlu0 %189 }
 0x178   :  { %v195_v20 = vsel %vm142_vm3, %v190_v19, 0 }
 0x179   :  { %1509 = vmatpush3.bf16.xpose.msra.mxu0 %v195_v20 }
 0x17a   :  { %1520 = vmatprep.subr.bf16.mxu0 %v1749_v0 }
 0x17c   :  { %1505 = vmatmul.mubr.msk.bf16.vlgmr.msra.gmra.mrb[0].mxu1 %vm142_vm3, %v1882_v15 }
 0x17d   :  { %1516 = vmatprep.mubr.msk.bf16.mxu1 %vm1750_vm0, %v1749_v0 }
 0x180   :  { %1511 = vmatmul.mubr.msk.bf16.vlgmr.msra.gmra.mrb[4].mxu0 %vm142_vm3, %v1885_v16 }
 0x181   :  { %1522 = vmatprep.mubr.msk.bf16.mxu0 %vm1750_vm0, %v1749_v0 }
 0x24f   :  { %v183_v21 = vpop.f32.mrb[0].mxu1 }
 0x250   :  { %v1506_v22 = vpop.f32.mrb[1].mxu1  ;;  %v237_v23 = vsel %vm142_vm3, %v183_v21, -inf }
 0x251   :  { %238 = vmax.xlane.f32.xlu1 %v237_v23  ;;  %v186_v24 = vpop.f32.mrb[2].mxu1 }
 0x252   :  { %v1507_v25 = vpop.f32.mrb[3].mxu1 }
 0x253   :  { %v231_v26 = vpop.f32.mrb[4].mxu0 }
 0x254   :  { %v1512_v27 = vpop.f32.mrb[5].mxu0  ;;  %v240_v28 = vsel %vm142_vm3, %v231_v26, -inf }
 0x255   :  { %241 = vmax.xlane.f32.xlu1 %v240_v28  ;;  %v234_v29 = vpop.f32.mrb[6].mxu0 }
 0x256   :  { %v1513_v30 = vpop.f32.mrb[7].mxu0 }
 0x266   :  { %261 = vrot.lane.b32.xlu1 %v1882_v15, %s1747_s18 }
 0x26a   :  { %310 = vrot.lane.b32.xlu1 %v1885_v16, %s1747_s18  ;;  %s1758_s18 = smov 72  }
 0x26e   :  { %367 = vrot.lane.b32.xlu1 %v1882_v15, %s1752_s2 }
 0x2de   :  { %v239_v31 = vpop.xlane.xlu1 %238 }
 0x2df   :  { %v243_v32 = vsub.f32 %v183_v21, %v239_v31 }
 0x2e1   :  { %v245_v33 = vmul.f32 1.442695, %v243_v32 }
 0x2e2   :  { %v242_v34 = vpop.xlane.xlu1 %241 }
 0x2e3   :  { %1658 = vpow2.f32 %v245_v33  ;;  %v244_v35 = vsub.f32 %v231_v26, %v242_v34 }
 0x2e5   :  { %v247_v36 = vmul.f32 1.442695, %v244_v35 }
 0x2e6   :  { %v262_v37 = vpop.permute.xlu1 %261 }
 0x2e7   :  { %1660 = vpow2.f32 %v247_v36  ;;  %v268_v38 = vsel %vm266_vm4, %v262_v37, 0 }
 0x2e8   :  { %1515 = vmatpush3.bf16.msra.mxu1 %v268_v38 }
 0x2e9   :  { %1526 = vmatprep.subr.bf16.mxu1 %v1749_v0 }
 0x2ea   :  { %v311_v39 = vpop.permute.xlu1 %310 }
 0x2eb   :  { %v316_v40 = vsel %vm266_vm4, %v311_v39, 0 }
 0x2ec   :  { %1521 = vmatpush3.bf16.msra.mxu0 %v316_v40 }
 0x2ed   :  { %v1659_v41 = vpop.eup %1658  ;;  %1532 = vmatprep.subr.bf16.mxu0 %v1749_v0 }
 0x2ee   :  { %v249_v42 = vsel %vm142_vm3, %v1659_v41, 0.0  ;;  %v368_v45 = vpop.permute.xlu1 %367 }
 0x2ef   :  { %250 = vadd.xlane.f32.xlu0 %v249_v42  ;;  %v373_v52 = vsel %vm142_vm3, %v368_v45, 0 }
 0x2f1   :  { %v1661_v43 = vpop.eup %1660 }
 0x2f2   :  { %v252_v44 = vsel %vm142_vm3, %v1661_v43, 0.0 }
 0x2f3   :  { %253 = vadd.xlane.f32.xlu1 %v252_v44 }
 0x304   :  { %418 = vrot.lane.b32.xlu1 %v1885_v16, %s1752_s2 }
 0x305   :  { %365 = vrot.lane.b32.xlu0 %v1882_v15, %s1753_s30 }
 0x308   :  { %416 = vrot.lane.b32.xlu1 %v1885_v16, %s1753_s30 }
 0x37c   :  { %v251_v46 = vpop.xlane.xlu0 %250 }
 0x37d   :  { %1662 = vrcp.f32 %v251_v46 }
 0x380   :  { %v254_v47 = vpop.xlane.xlu1 %253  ;;  %v366_v57 = vpop.permute.xlu0 %365 }
 0x381   :  { %1664 = vrcp.f32 %v254_v47 }
 0x384   :  { %v419_v54 = vpop.permute.xlu1 %418 }
 0x385   :  { %v424_v56 = vsel %vm142_vm3, %v419_v54, 0 }
 0x387   :  { %v1663_v48 = vpop.eup %1662 }
 0x388   :  { %v257_v49 = vmul.f32 %v1663_v48, %v1659_v41  ;;  %v417_v58 = vpop.permute.xlu1 %416 }
 0x38a   :  { %v259_v50 = vpack.c.bf16 %v257_v49, %v257_v49 }
 0x38b   :  { %v1665_v51 = vpop.eup %1664 }
 0x38c   :  { %v258_v53 = vmul.f32 %v1665_v51, %v1661_v43  ;;  %1517 = vmatmul.mubr.msk.bf16.vlgmr.msra.gmra.mrb[4].mxu1 %vm142_vm3, %v259_v50 }
 0x38d   :  { %1527 = vmatpush3.bf16.xpose.msra.mxu1 %v373_v52  ;;  %1528 = vmatprep.mubr.msk.bf16.mxu1 %vm1750_vm0, %v1749_v0 }
 0x38e   :  { %v260_v55 = vpack.c.bf16 %v258_v53, %v258_v53  ;;  %1538 = vmatprep.subr.bf16.mxu1 %v1749_v0 }
 0x390   :  { %1523 = vmatmul.mubr.msk.bf16.vlgmr.msra.gmra.mrb[8].mxu0 %vm142_vm3, %v260_v55 }
 0x391   :  { %1533 = vmatpush3.bf16.xpose.msra.mxu0 %v424_v56  ;;  %1534 = vmatprep.mubr.msk.bf16.mxu0 %vm1750_vm0, %v1749_v0 }
 0x392   :  { %1544 = vmatprep.subr.bf16.mxu0 %v1749_v0 }
 0x394   :  { %1529 = vmatmul.mubr.msk.bf16.vlgmr.msra.gmra.mrb[8].mxu1 %vm142_vm3, %v366_v57 }
 0x395   :  { %1540 = vmatprep.mubr.msk.bf16.mxu1 %vm1750_vm0, %v1749_v0 }
 0x398   :  { %1535 = vmatmul.mubr.msk.bf16.vlgmr.msra.gmra.mrb[12].mxu0 %vm142_vm3, %v417_v58 }
 0x399   :  { %1546 = vmatprep.mubr.msk.bf16.mxu0 %vm1750_vm0, %v1749_v0 }
 0x45f   :  { %v304_v59 = vpop.f32.mrb[4].mxu1 }
 0x460   :  { %v1518_v60 = vpop.f32.mrb[5].mxu1 }
 0x461   :  { %v307_v61 = vpop.f32.mrb[6].mxu1 }
 0x462   :  { %v1519_v62 = vpop.f32.mrb[7].mxu1 }
 0x463   :  { %v352_v63 = vpop.f32.mrb[8].mxu0 }
 0x464   :  { %v358_v1 = vpack.c.bf16 %v352_v63, %v304_v59  ;;  %v1524_v2 = vpop.f32.mrb[9].mxu0 }
 0x465   :  { %v355_v5 = vpop.f32.mrb[10].mxu0 }
 0x466   :  { %359 = vst.msk [vmem:[#allocation3] sm:$0xff] %vm142_vm3, %v358_v1  ;;  %v1525_v6 = vpop.f32.mrb[11].mxu0 }
 0x467   :  { %v409_v7 = vpop.f32.mrb[8].mxu1 }
 0x468   :  { %v1530_v8 = vpop.f32.mrb[9].mxu1  ;;  %v466_v9 = vsel %vm142_vm3, %v409_v7, -inf }
 0x469   :  { %467 = vmax.xlane.f32.xlu1 %v466_v9  ;;  %v412_v10 = vpop.f32.mrb[10].mxu1 }
 0x46a   :  { %v1531_v11 = vpop.f32.mrb[11].mxu1 }
 0x46b   :  { %v460_v12 = vpop.f32.mrb[12].mxu0 }
 0x46c   :  { %v1536_v13 = vpop.f32.mrb[13].mxu0  ;;  %v469_v14 = vsel %vm142_vm3, %v460_v12, -inf }
 0x46d   :  { %470 = vmax.xlane.f32.xlu0 %v469_v14  ;;  %v463_v17 = vpop.f32.mrb[14].mxu0 }
 0x46e   :  { %v1537_v18 = vpop.f32.mrb[15].mxu0 }
 0x47a   :  { %490 = vrot.lane.b32.xlu1 %v1882_v15, %s1754_s14 }
 0x47e   :  { %600 = vrot.lane.b32.xlu1 %v1882_v15, %s1755_s15 }
 0x483   :  { %538 = vrot.lane.b32.xlu0 %v1885_v16, %s1754_s14 }
 0x487   :  { %598 = vrot.lane.b32.xlu0 %v1882_v15, %s1756_s16 }
 0x4f6   :  { %v468_v19 = vpop.xlane.xlu1 %467 }
 0x4f7   :  { %v472_v20 = vsub.f32 %v409_v7, %v468_v19 }
 0x4f9   :  { %v474_v21 = vmul.f32 1.442695, %v472_v20 }
 0x4fa   :  { %v491_v22 = vpop.permute.xlu1 %490  ;;  %v471_v23 = vpop.xlane.xlu0 %470 }
 0x4fb   :  { %1666 = vpow2.f32 %v474_v21  ;;  %v496_v24 = vsel %vm266_vm4, %v491_v22, 0  ;;  %v473_v25 = vsub.f32 %v460_v12, %v471_v23 }
 0x4fc   :  { %1539 = vmatpush3.bf16.msra.mxu1 %v496_v24 }
 0x4fd   :  { %v476_v26 = vmul.f32 1.442695, %v473_v25  ;;  %1550 = vmatprep.subr.bf16.mxu1 %v1749_v0 }
 0x4fe   :  { %v539_v27 = vpop.permute.xlu0 %538  ;;  %v601_v33 = vpop.permute.xlu1 %600 }
 0x4ff   :  { %1668 = vpow2.f32 %v476_v26  ;;  %v544_v28 = vsel %vm266_vm4, %v539_v27, 0  ;;  %v606_v40 = vsel %vm142_vm3, %v601_v33, 0 }
 0x500   :  { %1545 = vmatpush3.bf16.msra.mxu0 %v544_v28 }
 0x501   :  { %1556 = vmatprep.subr.bf16.mxu0 %v1749_v0 }
 0x502   :  { %v599_v45 = vpop.permute.xlu0 %598 }
 0x505   :  { %v1667_v29 = vpop.eup %1666 }
 0x506   :  { %v478_v30 = vsel %vm142_vm3, %v1667_v29, 0.0 }
 0x507   :  { %479 = vadd.xlane.f32.xlu1 %v478_v30 }
 0x509   :  { %v1669_v31 = vpop.eup %1668 }
 0x50a   :  { %v481_v32 = vsel %vm142_vm3, %v1669_v31, 0.0 }
 0x50b   :  { %482 = vadd.xlane.f32.xlu1 %v481_v32 }
 0x51c   :  { %651 = vrot.lane.b32.xlu1 %v1885_v16, %s1755_s15 }
 0x520   :  { %649 = vrot.lane.b32.xlu1 %v1885_v16, %s1756_s16 }
 0x594   :  { %v480_v34 = vpop.xlane.xlu1 %479 }
 0x595   :  { %1670 = vrcp.f32 %v480_v34 }
 0x598   :  { %v483_v35 = vpop.xlane.xlu1 %482 }
 0x599   :  { %1672 = vrcp.f32 %v483_v35 }
 0x59c   :  { %v652_v42 = vpop.permute.xlu1 %651 }
 0x59d   :  { %v657_v44 = vsel %vm142_vm3, %v652_v42, 0 }
 0x59f   :  { %v1671_v36 = vpop.eup %1670 }
 0x5a0   :  { %v486_v37 = vmul.f32 %v1671_v36, %v1667_v29  ;;  %v650_v46 = vpop.permute.xlu1 %649 }
 0x5a2   :  { %v488_v38 = vpack.c.bf16 %v486_v37, %v486_v37 }
 0x5a3   :  { %v1673_v39 = vpop.eup %1672 }
 0x5a4   :  { %v487_v41 = vmul.f32 %v1673_v39, %v1669_v31  ;;  %1541 = vmatmul.mubr.msk.bf16.vlgmr.msra.gmra.mrb[12].mxu1 %vm142_vm3, %v488_v38 }
 0x5a5   :  { %1551 = vmatpush3.bf16.xpose.msra.mxu1 %v606_v40  ;;  %1552 = vmatprep.mubr.msk.bf16.mxu1 %vm1750_vm0, %v1749_v0 }
 0x5a6   :  { %v489_v43 = vpack.c.bf16 %v487_v41, %v487_v41  ;;  %1562 = vmatprep.subr.bf16.mxu1 %v1749_v0 }
 0x5a8   :  { %1547 = vmatmul.mubr.msk.bf16.vlgmr.msra.gmra.mrb[16].mxu0 %vm142_vm3, %v489_v43 }
 0x5a9   :  { %1557 = vmatpush3.bf16.xpose.msra.mxu0 %v657_v44  ;;  %1558 = vmatprep.mubr.msk.bf16.mxu0 %vm1750_vm0, %v1749_v0 }
 0x5aa   :  { %1568 = vmatprep.subr.bf16.mxu0 %v1749_v0 }
 0x5ac   :  { %1553 = vmatmul.mubr.msk.bf16.vlgmr.msra.gmra.mrb[16].mxu1 %vm142_vm3, %v599_v45 }
 0x5ad   :  { %1564 = vmatprep.mubr.msk.bf16.mxu1 %vm1750_vm0, %v1749_v0 }
 0x5b0   :  { %1559 = vmatmul.mubr.msk.bf16.vlgmr.msra.gmra.mrb[20].mxu0 %vm142_vm3, %v650_v46 }
 0x5b1   :  { %1570 = vmatprep.mubr.msk.bf16.mxu0 %vm1750_vm0, %v1749_v0 }
 0x677   :  { %v1963_v47 = vpop.f32.mrb[12].mxu1 }
 0x678   :  { %v1542_v48 = vpop.f32.mrb[13].mxu1 }
 0x679   :  { %v535_v49 = vpop.f32.mrb[14].mxu1 }
 0x67a   :  { %v1543_v50 = vpop.f32.mrb[15].mxu1 }
 0x67b   :  { %v1965_v51 = vpop.f32.mrb[16].mxu0 }
 0x67c   :  { %v586_v52 = vpack.c.bf16 %v1965_v51, %v1963_v47  ;;  %v1548_v53 = vpop.f32.mrb[17].mxu0 }
 0x67d   :  { %v583_v54 = vpop.f32.mrb[18].mxu0 }
 0x67e   :  { %v1549_v55 = vpop.f32.mrb[19].mxu0 }
 0x67f   :  { %v642_v56 = vpop.f32.mrb[16].mxu1 }
 0x680   :  { %v1554_v57 = vpop.f32.mrb[17].mxu1  ;;  %v699_v58 = vsel %vm142_vm3, %v642_v56, -inf }
 0x681   :  { %700 = vmax.xlane.f32.xlu0 %v699_v58  ;;  %v645_v59 = vpop.f32.mrb[18].mxu1 }
 0x682   :  { %v1555_v60 = vpop.f32.mrb[19].mxu1 }
 0x683   :  { %v693_v61 = vpop.f32.mrb[20].mxu0 }
 0x684   :  { %v1560_v62 = vpop.f32.mrb[21].mxu0  ;;  %v702_v63 = vsel %vm142_vm3, %v693_v61, -inf }
 0x685   :  { %703 = vmax.xlane.f32.xlu1 %v702_v63  ;;  %v696_v1 = vpop.f32.mrb[22].mxu0 }
 0x686   :  { %v1561_v2 = vpop.f32.mrb[23].mxu0 }
 0x696   :  { %723 = vrot.lane.b32.xlu1 %v1882_v15, %s1757_s17 }
 0x69a   :  { %833 = vrot.lane.b32.xlu1 %v1882_v15, %s1758_s18 }
 0x69e   :  { %884 = vrot.lane.b32.xlu1 %v1885_v16, %s1758_s18 }
 0x6a2   :  { %882 = vrot.lane.b32.xlu1 %v1885_v16, %s1759_s19 }
 0x70e   :  { %v701_v5 = vpop.xlane.xlu0 %700 }
 0x70f   :  { %v705_v6 = vsub.f32 %v642_v56, %v701_v5 }
 0x711   :  { %v707_v7 = vmul.f32 1.442695, %v705_v6 }
 0x712   :  { %v704_v8 = vpop.xlane.xlu1 %703 }
 0x713   :  { %1674 = vpow2.f32 %v707_v7  ;;  %v706_v9 = vsub.f32 %v693_v61, %v704_v8 }
 0x715   :  { %v709_v10 = vmul.f32 1.442695, %v706_v9 }
 0x716   :  { %v724_v11 = vpop.permute.xlu1 %723 }
 0x717   :  { %1676 = vpow2.f32 %v709_v10  ;;  %v729_v12 = vsel %vm266_vm4, %v724_v11, 0 }
 0x718   :  { %1563 = vmatpush3.bf16.msra.mxu1 %v729_v12 }
 0x719   :  { %1574 = vmatprep.subr.bf16.mxu1 %v1749_v0 }
 0x71a   :  { %v834_v24 = vpop.permute.xlu1 %833 }
 0x71b   :  { %v839_v28 = vsel %vm142_vm3, %v834_v24, 0 }
 0x71d   :  { %v1675_v13 = vpop.eup %1674 }
 0x71e   :  { %v711_v14 = vsel %vm142_vm3, %v1675_v13, 0.0  ;;  %v885_v30 = vpop.permute.xlu1 %884 }
 0x71f   :  { %712 = vadd.xlane.f32.xlu0 %v711_v14  ;;  %v890_v32 = vsel %vm142_vm3, %v885_v30, 0  ;;  %v1430_v30 = vld [vmem:[%s2097_s4] ss:$0 sm:$0xff] }
 0x721   :  { %v1677_v17 = vpop.eup %1676 }
 0x722   :  { %v714_v18 = vsel %vm142_vm3, %v1677_v17, 0.0  ;;  %v883_v34 = vpop.permute.xlu1 %882 }
 0x723   :  { %715 = vadd.xlane.f32.xlu0 %v714_v18  ;;  %v1651_v18 = vld [vmem:[%s2096_s3 + $0x8] sm:$0xff]  }
 0x739   :  { %771 = vrot.lane.b32.xlu0 %v1885_v16, %s1757_s17 }
 0x73d   :  { %831 = vrot.lane.b32.xlu0 %v1882_v15, %s1759_s19 }
 0x7ac   :  { %v713_v19 = vpop.xlane.xlu0 %712 }
 0x7ad   :  { %1678 = vrcp.f32 %v713_v19 }
 0x7b0   :  { %v716_v20 = vpop.xlane.xlu0 %715 }
 0x7b1   :  { %1680 = vrcp.f32 %v716_v20 }
 0x7b4   :  { %v772_v21 = vpop.permute.xlu0 %771 }
 0x7b5   :  { %v777_v22 = vsel %vm266_vm4, %v772_v21, 0 }
 0x7b6   :  { %1569 = vmatpush3.bf16.msra.mxu0 %v777_v22 }
 0x7b7   :  { %v1679_v23 = vpop.eup %1678  ;;  %1580 = vmatprep.subr.bf16.mxu0 %v1749_v0 }
 0x7b8   :  { %v719_v25 = vmul.f32 %v1679_v23, %v1675_v13  ;;  %v832_v33 = vpop.permute.xlu0 %831 }
 0x7ba   :  { %v721_v26 = vpack.c.bf16 %v719_v25, %v719_v25 }
 0x7bb   :  { %v1681_v27 = vpop.eup %1680 }
 0x7bc   :  { %v720_v29 = vmul.f32 %v1681_v27, %v1677_v17  ;;  %1565 = vmatmul.mubr.msk.bf16.vlgmr.msra.gmra.mrb[20].mxu1 %vm142_vm3, %v721_v26  ;;  %v1650_v17 = vld [vmem:[%s2096_s3] sm:$0xff]  }
 0x7bd   :  { %1575 = vmatpush3.bf16.xpose.msra.mxu1 %v839_v28  ;;  %1576 = vmatprep.mubr.msk.bf16.mxu1 %vm1750_vm0, %v1749_v0 }
 0x7be   :  { %v722_v31 = vpack.c.bf16 %v720_v29, %v720_v29  ;;  %1586 = vmatprep.subr.bf16.mxu1 %v1749_v0 }
 0x7c0   :  { %1571 = vmatmul.mubr.msk.bf16.vlgmr.msra.gmra.mrb[24].mxu0 %vm142_vm3, %v722_v31 }
 0x7c1   :  { %1581 = vmatpush3.bf16.xpose.msra.mxu0 %v890_v32  ;;  %1582 = vmatprep.mubr.msk.bf16.mxu0 %vm1750_vm0, %v1749_v0 }
 0x7c2   :  { %1592 = vmatprep.subr.bf16.mxu0 %v1749_v0 }
 0x7c4   :  { %1577 = vmatmul.mubr.msk.bf16.vlgmr.msra.gmra.mrb[24].mxu1 %vm142_vm3, %v832_v33 }
 0x7c5   :  { %1588 = vmatprep.mubr.msk.bf16.mxu1 %vm1750_vm0, %v1749_v0 }
 0x7c8   :  { %1583 = vmatmul.mubr.msk.bf16.vlgmr.msra.gmra.mrb[28].mxu0 %vm142_vm3, %v883_v34 }
 0x7c9   :  { %1594 = vmatprep.mubr.msk.bf16.mxu0 %vm1750_vm0, %v1749_v0 }
 0x88f   :  { %v765_v35 = vpop.f32.mrb[20].mxu1 }
 0x890   :  { %v1566_v36 = vpop.f32.mrb[21].mxu1 }
 0x891   :  { %v768_v37 = vpop.f32.mrb[22].mxu1 }
 0x892   :  { %v1567_v38 = vpop.f32.mrb[23].mxu1 }
 0x893   :  { %v813_v39 = vpop.f32.mrb[24].mxu0 }
 0x894   :  { %v819_v40 = vpack.c.bf16 %v813_v39, %v765_v35  ;;  %v1572_v41 = vpop.f32.mrb[25].mxu0 }
 0x895   :  { %v816_v42 = vpop.f32.mrb[26].mxu0 }
 0x896   :  { %v1573_v43 = vpop.f32.mrb[27].mxu0 }
 0x897   :  { %v875_v44 = vpop.f32.mrb[24].mxu1 }
 0x898   :  { %v1578_v45 = vpop.f32.mrb[25].mxu1  ;;  %v932_v46 = vsel %vm142_vm3, %v875_v44, -inf }
 0x899   :  { %933 = vmax.xlane.f32.xlu0 %v932_v46  ;;  %v878_v48 = vpop.f32.mrb[26].mxu1  ;;  %v1652_v45 = vld [vmem:[#allocation4] sm:$0xff]   ;;  %v1655_v46 = vld [vmem:[%s2100_s7 + $0x8] sm:$0xff]  }
 0x89a   :  { %v1579_v49 = vpop.f32.mrb[27].mxu1 }
 0x89b   :  { %v926_v50 = vpop.f32.mrb[28].mxu0 }
 0x89c   :  { %v1584_v53 = vpop.f32.mrb[29].mxu0  ;;  %v935_v54 = vsel %vm142_vm3, %v926_v50, -inf }
 0x89d   :  { %936 = vmax.xlane.f32.xlu1 %v935_v54  ;;  %v929_v55 = vpop.f32.mrb[30].mxu0 }
 0x89e   :  { %v1585_v56 = vpop.f32.mrb[31].mxu0 }
 0x8ae   :  { %956 = vrot.lane.b32.xlu1 %v1882_v15, %s1760_s20 }
 0x8b2   :  { %588 = vrot.lane.b32.xlu1 %v586_v52, %s1761_s21 }
 0x8b6   :  { %821 = vrot.lane.b32.xlu1 %v819_v40, %s1762_s22 }
 0x926   :  { %v934_v57 = vpop.xlane.xlu0 %933 }
 0x927   :  { %v938_v58 = vsub.f32 %v875_v44, %v934_v57 }
 0x929   :  { %v940_v59 = vmul.f32 1.442695, %v938_v58 }
 0x92a   :  { %v937_v60 = vpop.xlane.xlu1 %936 }
 0x92b   :  { %1682 = vpow2.f32 %v940_v59  ;;  %v939_v61 = vsub.f32 %v926_v50, %v937_v60 }
 0x92d   :  { %v942_v62 = vmul.f32 1.442695, %v939_v61 }
 0x92e   :  { %v957_v63 = vpop.permute.xlu1 %956 }
 0x92f   :  { %1684 = vpow2.f32 %v942_v62  ;;  %v962_v1 = vsel %vm266_vm4, %v957_v63, 0 }
 0x930   :  { %1587 = vmatpush3.bf16.msra.mxu1 %v962_v1 }
 0x931   :  { %1598 = vmatprep.subr.bf16.mxu1 %v1749_v0 }
 0x932   :  { %v589_v15 = vpop.permute.xlu1 %588 }
 0x933   :  { %592 = vst.msk [vmem:[#allocation3] sm:$0xff] %vm591_vm5, %v589_v15 }
 0x935   :  { %v1683_v47 = vpop.eup %1682 }
 0x936   :  { %v822_v51 = vpop.permute.xlu1 %821  ;;  %v944_v52 = vsel %vm142_vm3, %v1683_v47, 0.0 }
 0x937   :  { %825 = vst.msk [vmem:[#allocation3] sm:$0xff] %vm824_vm6, %v822_v51  ;;  %945 = vadd.xlane.f32.xlu0 %v944_v52 }
 0x939   :  { %v1685_v2 = vpop.eup %1684 }
 0x93a   :  { %v947_v5 = vsel %vm142_vm3, %v1685_v2, 0.0 }
 0x93b   :  { %948 = vadd.xlane.f32.xlu0 %v947_v5 }
 0x951   :  { %1004 = vrot.lane.b32.xlu0 %v1885_v16, %s1760_s20 }
 0x9c4   :  { %v946_v6 = vpop.xlane.xlu0 %945 }
 0x9c5   :  { %1686 = vrcp.f32 %v946_v6 }
 0x9c8   :  { %v949_v7 = vpop.xlane.xlu0 %948 }
 0x9c9   :  { %1688 = vrcp.f32 %v949_v7  ;;  %v1435_v7 = vld [vmem:[%s2103_s10] ss:$0 sm:$0xff] }
 0x9cc   :  { %v1005_v8 = vpop.permute.xlu0 %1004 }
 0x9cd   :  { %v1010_v9 = vsel %vm266_vm4, %v1005_v8, 0 }
 0x9ce   :  { %1593 = vmatpush3.bf16.msra.mxu0 %v1010_v9 }
 0x9cf   :  { %v1687_v10 = vpop.eup %1686  ;;  %1606 = vmatprep.subr.bf16.mxu0 %v1749_v0 }
 0x9d0   :  { %v952_v11 = vmul.f32 %v1687_v10, %v1683_v47  ;;  %v1434_v47 = vld [vmem:[%s2102_s9] ss:$0 sm:$0xff] }
 0x9d2   :  { %v954_v12 = vpack.c.bf16 %v952_v11, %v952_v11 }
 0x9d3   :  { %v1689_v13 = vpop.eup %1688 }
 0x9d4   :  { %v953_v14 = vmul.f32 %v1689_v13, %v1685_v2  ;;  %1589 = vmatmul.mubr.msk.bf16.vlgmr.msra.gmra.mrb[28].mxu1 %vm142_vm3, %v954_v12  ;;  %v1656_v12 = vld [vmem:[%s2100_s7 + $0x10] sm:$0xff]   ;;  %v1657_v13 = vld [vmem:[%s2100_s7 + $0x18] sm:$0xff]  }
 0x9d5   :  { %1602 = vmatprep.mubr.msk.bf16.mxu1 %vm1750_vm0, %v1749_v0  ;;  %1599 = vmatpush3.bf16.msra.mxu1 %v1650_v17 }
 0x9d6   :  { %v955_v16 = vpack.c.bf16 %v953_v14, %v953_v14  ;;  %1600 = vmatprep.subr.bf16.mxu1 %v1749_v0  ;;  %v1436_v14 = vld [vmem:[%s2099_s6] ss:$0 sm:$0xff] }
 0x9d8   :  { %1595 = vmatmul.mubr.msk.bf16.vlgmr.msra.gmra.mrb[32].mxu0 %vm142_vm3, %v955_v16 }
 0x9d9   :  { %1610 = vmatprep.mubr.msk.bf16.mxu0 %vm1750_vm0, %v1749_v0  ;;  %1601 = vmatpush3.bf16.msra.mxu1 %v1651_v18 }
 0x9da   :  { %1614 = vmatprep.subr.bf16.mxu1 %v1749_v0  ;;  %1607 = vmatpush3.bf16.msra.mxu0 %v1652_v45 }
 0x9db   :  { %1608 = vmatprep.subr.bf16.mxu0 %v1749_v0 }
 0xaa7   :  { %v998_v19 = vpop.f32.mrb[28].mxu1 }
 0xaa8   :  { %v1590_v20 = vpop.f32.mrb[29].mxu1 }
 0xaa9   :  { %v1001_v21 = vpop.f32.mrb[30].mxu1 }
 0xaaa   :  { %v1591_v22 = vpop.f32.mrb[31].mxu1 }
 0xaab   :  { %v1046_v23 = vpop.f32.mrb[32].mxu0 }
 0xaac   :  { %v1052_v24 = vpack.c.bf16 %v1046_v23, %v998_v19  ;;  %v1596_v25 = vpop.f32.mrb[33].mxu0 }
 0xaad   :  { %v1049_v26 = vpop.f32.mrb[34].mxu0 }
 0xaae   :  { %1054 = vrot.lane.b32.xlu0 %v1052_v24, %s1763_s26  ;;  %v1597_v27 = vpop.f32.mrb[35].mxu0 }
 0xb20   :  { %v1055_v28 = vpop.permute.xlu0 %1054 }
 0xb21   :  { %1058 = vst.msk [vmem:[#allocation3] sm:$0xff] %vm1057_vm7, %v1055_v28 }
 0xb28   :  { %v1059_v29 = vld [vmem:[#allocation3] sm:$0xff] }
 0xb29   :  { %1603 = vmatmul.mubr.msk.bf16.vlgmr.msra.gmra.mrb[32].mxu1 %vm86_vm1, %v1059_v29 }
 0xb2a   :  { %1622 = vmatprep.mubr.msk.bf16.mxu1 %vm1750_vm0, %v1749_v0 }
 0xbfc   :  { %v1120_v31 = vpop.f32.mrb[32].mxu1 }
 0xbfd   :  { %v1121_v32 = vadd.f32 %v1430_v30, %v1120_v31  ;;  %v1604_v33 = vpop.f32.mrb[33].mxu1 }
 0xbfe   :  { %v1123_v34 = vpop.f32.mrb[34].mxu1 }
 0xbff   :  { %v1127_v35 = vadd.f32 %v1121_v32, %v1865_v3  ;;  %v1124_v36 = vadd.f32 %v1430_v30, %v1123_v34  ;;  %v1605_v37 = vpop.f32.mrb[35].mxu1  ;;  %v1653_v3 = vld [vmem:[#allocation4 + $0x8] sm:$0xff]  }
 0xc00   :  { %1609 = vmatpush3.bf16.msra.mxu0 %v1653_v3 }
 0xc01   :  { %v1128_v38 = vadd.f32 %v1124_v36, %v1870_v4  ;;  %v1129_v39 = vsel %vm86_vm1, %v1127_v35, 0.0  ;;  %v1138_v42 = vmul.f32 %v1127_v35, %v1127_v35  ;;  %v1654_v4 = vld [vmem:[%s2100_s7] sm:$0xff]  }
 0xc02   :  { %1130 = vadd.xlane.f32.xlu1 %v1129_v39  ;;  %1615 = vmatpush3.bf16.msra.mxu1 %v1654_v4 }
 0xc03   :  { %v1132_v40 = vsel %vm86_vm1, %v1128_v38, 0.0  ;;  %v1139_v41 = vmul.f32 %v1128_v38, %v1128_v38  ;;  %v1140_v44 = vsel %vm86_vm1, %v1138_v42, 0.0  ;;  %1616 = vmatprep.subr.bf16.mxu1 %v1749_v0 }
 0xc04   :  { %1133 = vadd.xlane.f32.xlu0 %v1132_v40 }
 0xc05   :  { %v1143_v43 = vsel %vm86_vm1, %v1139_v41, 0.0 }
 0xc06   :  { %1144 = vadd.xlane.f32.xlu1 %v1143_v43  ;;  %1617 = vmatpush3.bf16.msra.mxu1 %v1655_v46 }
 0xc07   :  { %1618 = vmatprep.subr.bf16.mxu1 %v1749_v0 }
 0xc08   :  { %1141 = vadd.xlane.f32.xlu0 %v1140_v44 }
 0xc0a   :  { %1619 = vmatpush3.bf16.msra.mxu1 %v1656_v12 }
 0xc0b   :  { %1620 = vmatprep.subr.bf16.mxu1 %v1749_v0  ;;  %v1440_v0 = vld [vmem:[%s2101_s8] ss:$0 sm:$0xff] }
 0xc0e   :  { %1621 = vmatpush3.bf16.msra.mxu1 %v1657_v13 }
 0xc8f   :  { %v1131_v48 = vpop.xlane.xlu1 %1130 }
 0xc90   :  { %v1136_v50 = vmul.f32 0.03125, %v1131_v48 }
 0xc91   :  { %v1134_v49 = vpop.xlane.xlu0 %1133 }
 0xc92   :  { %v1137_v53 = vmul.f32 0.03125, %v1134_v49  ;;  %v1148_v58 = vmul.f32 %v1136_v50, %v1136_v50  ;;  %v1152_v51 = vsub.f32 %v1127_v35, %v1136_v50 }
 0xc93   :  { %v1145_v54 = vpop.xlane.xlu1 %1144 }
 0xc94   :  { %v1149_v55 = vmul.f32 %v1137_v53, %v1137_v53  ;;  %v1147_v56 = vmul.f32 0.03125, %v1145_v54  ;;  %v1153_v1 = vsub.f32 %v1128_v38, %v1137_v53 }
 0xc95   :  { %v1142_v57 = vpop.xlane.xlu0 %1141 }
 0xc96   :  { %v1151_v59 = vsub.f32 %v1147_v56, %v1149_v55  ;;  %v1146_v60 = vmul.f32 0.03125, %v1142_v57  ;;  %v1446_v56 = vld [vmem:[%s2104_s11] ss:$0 sm:$0xff]  ;;  %s1720_s11 = scalar_lea.vmem %s1391_s5, 256 }
 0xc97   :  { %p1721_p8 = scmp.ne.s32.totalorder %s1391_s5, %s1720_s11  ;;  %p1726_p10 = scmp.lt.s32.totalorder %s1720_s11, %s1720_s11 }
 0xc98   :  { %v1155_v61 = vadd.f32 1e-05, %v1151_v59  ;;  %v1150_v62 = vsub.f32 %v1146_v60, %v1148_v58  ;;  %v1447_v60 = vld [vmem:[%s2105_s12] ss:$0 sm:$0xff] }
 0xc99   :  { %p1727_p11 = por %p1726_p10, %p1725_p9 }
 0xc9a   :  { %1690 = vrsqrt.f32 %v1155_v61  ;;  %v1154_v63 = vadd.f32 1e-05, %v1150_v62 }
 0xc9b   :  { %p1728_p12 = pnand %p1727_p11, %p1721_p8 }
 0xc9c   :  { %1692 = vrsqrt.f32 %v1154_v63 }
 0xca4   :  { %v1691_v15 = vpop.eup %1690 }
 0xca5   :  { %v1159_v52 = vmul.f32 %v1691_v15, %v1153_v1 }
 0xca6   :  { %v1693_v2 = vpop.eup %1692 }
 0xca7   :  { %v1158_v5 = vmul.f32 %v1693_v2, %v1152_v51  ;;  %v1168_v6 = vmul.f32 %v1434_v47, %v1159_v52 }
 0xca9   :  { %v1167_v8 = vmul.f32 %v1434_v47, %v1158_v5  ;;  %v1177_v10 = vadd.f32 %v1435_v7, %v1168_v6 }
 0xcab   :  { %v1176_v9 = vadd.f32 %v1435_v7, %v1167_v8 }
 0xcad   :  { %v1178_v11 = vpack.c.bf16 %v1177_v10, %v1176_v9 }
 0xcaf   :  { %1611 = vmatmul.mubr.msk.bf16.vlgmr.msra.gmra.mrb[36].mxu0 %vm86_vm1, %v1178_v11 }
 0xd82   :  { %v1239_v16 = vpop.f32.mrb[36].mxu0 }
 0xd83   :  { %v1240_v17 = vadd.f32 %v1436_v14, %v1239_v16  ;;  %v1612_v18 = vpop.f32.mrb[37].mxu0 }
 0xd84   :  { %v1242_v19 = vpop.f32.mrb[38].mxu0 }
 0xd85   :  { %v1243_v20 = vadd.f32 %v1436_v14, %v1242_v19  ;;  %v1613_v21 = vpop.f32.mrb[39].mxu0  ;;  %v1246_v22 = vmax.f32 %v1240_v17, 0.0 }
 0xd87   :  { %v1247_v23 = vmax.f32 %v1243_v20, 0.0 }
 0xd89   :  { %v1248_v24 = vpack.c.bf16 %v1247_v23, %v1246_v22 }
 0xd8b   :  { %1623 = vmatmul.mubr.msk.bf16.vlgmr.msra.gmra.mrb[36].mxu1 %vm1288_vm8, %v1248_v24 }
 0xe5e   :  { %v1326_v25 = vpop.f32.mrb[36].mxu1 }
 0xe5f   :  { %v1327_v26 = vadd.f32 %v1440_v0, %v1326_v25  ;;  %v1624_v27 = vpop.f32.mrb[37].mxu1 }
 0xe60   :  { %v1329_v28 = vpop.f32.mrb[38].mxu1 }
 0xe61   :  { %v1333_v29 = vadd.f32 %v1327_v26, %v1176_v9  ;;  %v1330_v30 = vadd.f32 %v1440_v0, %v1329_v28  ;;  %v1625_v31 = vpop.f32.mrb[39].mxu1 }
 0xe63   :  { %v1334_v32 = vadd.f32 %v1330_v30, %v1177_v10  ;;  %v1335_v33 = vsel %vm86_vm1, %v1333_v29, 0.0  ;;  %v1343_v34 = vmul.f32 %v1333_v29, %v1333_v29 }
 0xe64   :  { %1336 = vadd.xlane.f32.xlu0 %v1335_v33 }
 0xe65   :  { %v1338_v35 = vsel %vm86_vm1, %v1334_v32, 0.0  ;;  %v1344_v36 = vmul.f32 %v1334_v32, %v1334_v32  ;;  %v1345_v37 = vsel %vm86_vm1, %v1343_v34, 0.0 }
 0xe66   :  { %1339 = vadd.xlane.f32.xlu1 %v1338_v35 }
 0xe67   :  { %v1348_v38 = vsel %vm86_vm1, %v1344_v36, 0.0 }
 0xe68   :  { %1346 = vadd.xlane.f32.xlu0 %v1345_v37 }
 0xe6a   :  { %1349 = vadd.xlane.f32.xlu1 %v1348_v38 }
 0xef1   :  { %v1337_v39 = vpop.xlane.xlu0 %1336 }
 0xef2   :  { %v1341_v40 = vmul.f32 0.03125, %v1337_v39 }
 0xef3   :  { %v1340_v41 = vpop.xlane.xlu1 %1339 }
 0xef4   :  { %v1342_v42 = vmul.f32 0.03125, %v1340_v41  ;;  %v1353_v44 = vmul.f32 %v1341_v40, %v1341_v40  ;;  %v1357_v54 = vsub.f32 %v1333_v29, %v1341_v40 }
 0xef5   :  { %v1347_v43 = vpop.xlane.xlu0 %1346 }
 0xef6   :  { %v1351_v45 = vmul.f32 0.03125, %v1347_v43  ;;  %v1354_v4 = vmul.f32 %v1342_v42, %v1342_v42  ;;  %v1358_v57 = vsub.f32 %v1334_v32, %v1342_v42 }
 0xef7   :  { %v1350_v3 = vpop.xlane.xlu1 %1349 }
 0xef8   :  { %v1355_v46 = vsub.f32 %v1351_v45, %v1353_v44  ;;  %v1352_v48 = vmul.f32 0.03125, %v1350_v3 }
 0xefa   :  { %v1359_v49 = vadd.f32 1e-05, %v1355_v46  ;;  %v1356_v50 = vsub.f32 %v1352_v48, %v1354_v4 }
 0xefc   :  { %1694 = vrsqrt.f32 %v1359_v49  ;;  %v1360_v53 = vadd.f32 1e-05, %v1356_v50 }
 0xefe   :  { %1696 = vrsqrt.f32 %v1360_v53 }
 0xf06   :  { %v1695_v55 = vpop.eup %1694 }
 0xf07   :  { %v1363_v58 = vmul.f32 %v1695_v55, %v1357_v54 }
 0xf08   :  { %v1697_v59 = vpop.eup %1696 }
 0xf09   :  { %v1364_v61 = vmul.f32 %v1697_v59, %v1358_v57  ;;  %v1372_v62 = vmul.f32 %v1446_v56, %v1363_v58 }
 0xf0b   :  { %v1373_v63 = vmul.f32 %v1446_v56, %v1364_v61  ;;  %v1381_v1 = vadd.f32 %v1447_v60, %v1372_v62 }
 0xf0d   :  { %v1382_v15 = vadd.f32 %v1447_v60, %v1373_v63  ;;  %1383 = vst.msk [vmem:[#allocation7] sm:$0xff] %vm86_vm1, %v1381_v1 }
 0xf0f   :  { %1384 = vst.msk [vmem:[#allocation7 + $0x8] sm:$0xff] %vm86_vm1, %v1382_v15 }
 0xf10   :  { %1731 = shalt.err (!%p1728_p12)
}
 0xf11   :  { %s1732_s25 = scalar_lea.hbm %s2106_s13, 256 }
 0xf12   :  { %p1733_p13 = scmp.ne.s32.totalorder %s2106_s13, %s1732_s25  ;;  %p1736_p0 = scmp.lt.u32.totalorder %s1732_s25, %s2106_s13 }
 0xf14   :  { %p1738_p1 = pnand %p1736_p0, %p1733_p13 }
 0xf16   :  { %1741 = shalt.err (!%p1738_p1)
}
 0xf17   :  { %s1765_s28 = smov 128  }
 0xf18   :  { %1396 = dma.vmem_to_hbm [thread:$0]  %s1391_s5, 256, %s2106_s13, [#allocation6], %s1765_s28, %s1765_s28, %s1761_s21  }
 0xf19   :  { %1744 = dma.done.wait [#allocation6], 256  }
 0xf1a   :  { %1745 = vsyncadd [#allocation6], 4294967040 }
 0xf1b   :  { %1400 = vsyncpa [#allocation5], 1 }
 0xf1c   :  { %1401 = vsyncpa [#allocation6], 1 }

// kernel: tpu_custom_call.1
= control target key start
LH: loop header
LB: loop body
LE: loop exit
PB: predicated region body
PF: predicated region fallthrough
CT: control target
= control target key end

     0   :  { %18 = vsyncpa [#allocation5], 0  ;;  %s2093_s0 = inlined_call_operand.vmem [shape: f32[2,8,32], index: 0, kind: input, shape index: {}]   ;;  %s2094_s1 = inlined_call_operand.vmem [shape: bf16[32,96], index: 1, kind: input, shape index: {}]   ;;  %s2095_s2 = inlined_call_operand.vmem [shape: f32[1,96], index: 2, kind: input, shape index: {}]   ;;  %s2096_s3 = inlined_call_operand.vmem [shape: bf16[32,32], index: 3, kind: input, shape index: {}]   ;;  %s2097_s4 = inlined_call_operand.vmem [shape: f32[1,32], index: 4, kind: input, shape index: {}]   ;;  %s2098_s5 = inlined_call_operand.hbm [shape: bf16[32,64], index: 5, kind: input, shape index: {}]   ;;  %s2099_s6 = inlined_call_operand.vmem [shape: f32[1,64], index: 6, kind: input, shape index: {}]   ;;  %s2100_s7 = inlined_call_operand.vmem [shape: bf16[64,32], index: 7, kind: input, shape index: {}]   ;;  %s2101_s8 = inlined_call_operand.vmem [shape: f32[1,32], index: 8, kind: input, shape index: {}]   ;;  %s2102_s9 = inlined_call_operand.vmem [shape: f32[1,32], index: 9, kind: input, shape index: {}]   ;;  %s2103_s10 = inlined_call_operand.vmem [shape: f32[1,32], index: 10, kind: input, shape index: {}]   ;;  %s2104_s11 = inlined_call_operand.vmem [shape: f32[1,32], index: 11, kind: input, shape index: {}]   ;;  %s2105_s12 = inlined_call_operand.vmem [shape: f32[1,32], index: 12, kind: input, shape index: {}]   ;;  %s2106_s13 = inlined_call_operand.hbm [shape: f32[2,8,32], index: 13, kind: output, shape index: {}]  }
   0x1   :  { %19 = vsyncpa [#allocation6], 0  ;;  %s1746_s25 = smov [#allocation4]   ;;  %s1698_s29 = scalar_lea.hbm %s2098_s5, 256 }
   0x2   :  { %s35_s26 = sshll.u32 %s1746_s25, 4  ;;  %p1699_p0 = scmp.ne.s32.totalorder %s2098_s5, %s1698_s29  ;;  %s36_s26 = int_to_ptr.vmem [resolvable:$true] %s35_s26 }
   0x3   :  { %p1702_p1 = scmp.lt.u32.totalorder %s1698_s29, %s2098_s5 }
   0x5   :  { %p1704_p2 = pnand %p1702_p1, %p1699_p0 }
   0x7   :  { %1707 = shalt.err (!%p1704_p2)
}
   0x8   :  { %s1708_s17 = scalar_lea.vmem %s36_s26, 256  ;;  %p1713_p4 = scmp.lt.s32.totalorder %s36_s26, %s36_s26 }
   0x9   :  { %p1709_p3 = scmp.ne.s32.totalorder %s36_s26, %s1708_s17  ;;  %p1714_p5 = scmp.lt.s32.totalorder %s1708_s17, %s1708_s17 }
   0xb   :  { %p1715_p6 = por %p1714_p5, %p1713_p4 }
   0xd   :  { %p1716_p7 = pnand %p1715_p6, %p1709_p3 }
   0xf   :  { %1719 = shalt.err (!%p1716_p7)
}
  0x10   :  { %s1747_s18 = smov 64   ;;  %s1748_s19 = smov 4  }
  0x11   :  { %41 = dma.hbm_to_vmem [thread:$0]  %s2098_s5, 256, %s36_s26, [#allocation5], %s1747_s18, %s1747_s18, %s1748_s19  }
  0x12   :  { %1742 = dma.done.wait [#allocation5], 256  }
  0x13   :  { %1743 = vsyncadd [#allocation5], 4294967040  ;;  %v1749_v0 = vmov 0.0   ;;  %vm1750_vm0 = vmmov 0   ;;  %v1646_v1 = vld [vmem:[%s2094_s1] sm:$0xff]   ;;  %v1647_v2 = vld [vmem:[%s2094_s1 + $0x8] sm:$0xff]  }
  0x14   :  { %1494 = vmatprep.subr.bf16.mxu0 %v1749_v0  ;;  %1498 = vmatprep.mubr.msk.bf16.mxu0 %vm1750_vm0, %v1749_v0  ;;  %v1865_v3 = vld [vmem:[%s2093_s0] sm:$0xff]  ;;  %v1870_v4 = vld [vmem:[%s2093_s0 + $0x8] sm:$0xff]  ;;  %vm86_vm1 = vcmask 261120   ;;  %vm132_vm2 = vcmask 785408   ;;  %s1751_s0 = smov 96   ;;  %vm142_vm3 = vcmask 64512  }
  0x15   :  { %1502 = vmatprep.subr.bf16.mxu1 %v1749_v0  ;;  %1504 = vmatprep.mubr.msk.bf16.mxu1 %vm1750_vm0, %v1749_v0  ;;  %v62_v5 = vpack.c.bf16 %v1870_v4, %v1865_v3  ;;  %v1402_v6 = vld [vmem:[%s2095_s2] ss:$0 sm:$0xff]  ;;  %s1752_s2 = smov 88   ;;  %vm266_vm4 = vcmask 1043456   ;;  %s1753_s30 = smov 120   ;;  %vm591_vm5 = vcmask 130112  }
  0x16   :  { %1495 = vmatpush3.bf16.msra.mxu0 %v1646_v1  ;;  %s1754_s14 = smov 56   ;;  %s1755_s15 = smov 80   ;;  %vm824_vm6 = vcmask 195712   ;;  %vm1057_vm7 = vcmask 261312   ;;  %vm1288_vm8 = vcmask 523264  }
  0x17   :  { %1496 = vmatprep.subr.bf16.mxu0 %v1749_v0  ;;  %s1756_s16 = smov 112   ;;  %s1757_s17 = smov 48  }
  0x18   :  { %s1759_s19 = smov 104   ;;  %s1760_s20 = smov 40  }
  0x19   :  { %s1761_s21 = smov 8   ;;  %s1762_s22 = smov 16  }
  0x1a   :  { %1497 = vmatpush3.bf16.msra.mxu0 %v1647_v2  ;;  %s1763_s26 = smov 24   ;;  %s1764_s23 = smov [#allocation7]  }
  0x1b   :  { %1508 = vmatprep.subr.bf16.mxu0 %v1749_v0  ;;  %s1390_s5 = sshll.u32 %s1764_s23, 4  ;;  %s1391_s5 = int_to_ptr.vmem [resolvable:$true] %s1390_s5 }
  0x1c   :  { %p1725_p9 = scmp.lt.s32.totalorder %s1391_s5, %s1391_s5 }
  0x1d   :  { %1499 = vmatmul.mubr.msk.bf16.vlgmr.msra.gmra.mrb[0].mxu0 %vm86_vm1, %v62_v5 }
  0x1e   :  { %1510 = vmatprep.mubr.msk.bf16.mxu0 %vm1750_vm0, %v1749_v0 }
  0xf0   :  { %v124_v7 = vpop.f32.mrb[0].mxu0 }
  0xf1   :  { %v1500_v8 = vpop.f32.mrb[1].mxu0  ;;  %v125_v10 = vadd.f32 %v1402_v6, %v124_v7 }
  0xf2   :  { %v127_v9 = vpop.f32.mrb[2].mxu0 }
  0xf3   :  { %v128_v11 = vadd.f32 %v1402_v6, %v127_v9  ;;  %v1501_v12 = vpop.f32.mrb[3].mxu0 }
  0xf5   :  { %v131_v13 = vpack.c.bf16 %v128_v11, %v125_v10 }
  0xf7   :  { %133 = vst.msk [vmem:[#allocation2] sm:$0xff] %vm132_vm2, %v131_v13 }
  0xfe   :  { %v134_v14 = vld [vmem:[#allocation2] sm:$0xff] }
  0xff   :  { %v1882_v15 = vcombine.low %v134_v14, %v134_v14  ;;  %v1885_v16 = vcombine.high %v134_v14, %v134_v14 }
 0x101   :  { %140 = vrot.lane.b32.xlu0 %v1882_v15, %s1751_s0 }
 0x105   :  { %189 = vrot.lane.b32.xlu0 %v1885_v16, %s1751_s0 }
 0x173   :  { %v141_v17 = vpop.permute.xlu0 %140 }
 0x174   :  { %v147_v18 = vsel %vm142_vm3, %v141_v17, 0 }
 0x175   :  { %1503 = vmatpush3.bf16.xpose.msra.mxu1 %v147_v18 }
 0x176   :  { %1514 = vmatprep.subr.bf16.mxu1 %v1749_v0 }
 0x177   :  { %v190_v19 = vpop.permute.xlu0 %189 }
 0x178   :  { %v195_v20 = vsel %vm142_vm3, %v190_v19, 0 }
 0x179   :  { %1509 = vmatpush3.bf16.xpose.msra.mxu0 %v195_v20 }
 0x17a   :  { %1520 = vmatprep.subr.bf16.mxu0 %v1749_v0 }
 0x17c   :  { %1505 = vmatmul.mubr.msk.bf16.vlgmr.msra.gmra.mrb[0].mxu1 %vm142_vm3, %v1882_v15 }
 0x17d   :  { %1516 = vmatprep.mubr.msk.bf16.mxu1 %vm1750_vm0, %v1749_v0 }
 0x180   :  { %1511 = vmatmul.mubr.msk.bf16.vlgmr.msra.gmra.mrb[4].mxu0 %vm142_vm3, %v1885_v16 }
 0x181   :  { %1522 = vmatprep.mubr.msk.bf16.mxu0 %vm1750_vm0, %v1749_v0 }
 0x24f   :  { %v183_v21 = vpop.f32.mrb[0].mxu1 }
 0x250   :  { %v1506_v22 = vpop.f32.mrb[1].mxu1  ;;  %v237_v23 = vsel %vm142_vm3, %v183_v21, -inf }
 0x251   :  { %238 = vmax.xlane.f32.xlu1 %v237_v23  ;;  %v186_v24 = vpop.f32.mrb[2].mxu1 }
 0x252   :  { %v1507_v25 = vpop.f32.mrb[3].mxu1 }
 0x253   :  { %v231_v26 = vpop.f32.mrb[4].mxu0 }
 0x254   :  { %v1512_v27 = vpop.f32.mrb[5].mxu0  ;;  %v240_v28 = vsel %vm142_vm3, %v231_v26, -inf }
 0x255   :  { %241 = vmax.xlane.f32.xlu1 %v240_v28  ;;  %v234_v29 = vpop.f32.mrb[6].mxu0 }
 0x256   :  { %v1513_v30 = vpop.f32.mrb[7].mxu0 }
 0x266   :  { %261 = vrot.lane.b32.xlu1 %v1882_v15, %s1747_s18 }
 0x26a   :  { %310 = vrot.lane.b32.xlu1 %v1885_v16, %s1747_s18  ;;  %s1758_s18 = smov 72  }
 0x26e   :  { %367 = vrot.lane.b32.xlu1 %v1882_v15, %s1752_s2 }
 0x2de   :  { %v239_v31 = vpop.xlane.xlu1 %238 }
 0x2df   :  { %v243_v32 = vsub.f32 %v183_v21, %v239_v31 }
 0x2e1   :  { %v245_v33 = vmul.f32 1.442695, %v243_v32 }
 0x2e2   :  { %v242_v34 = vpop.xlane.xlu1 %241 }
 0x2e3   :  { %1658 = vpow2.f32 %v245_v33  ;;  %v244_v35 = vsub.f32 %v231_v26, %v242_v34 }
 0x2e5   :  { %v247_v36 = vmul.f32 1.442695, %v244_v35 }
 0x2e6   :  { %v262_v37 = vpop.permute.xlu1 %261 }
 0x2e7   :  { %1660 = vpow2.f32 %v247_v36  ;;  %v268_v38 = vsel %vm266_vm4, %v262_v37, 0 }
 0x2e8   :  { %1515 = vmatpush3.bf16.msra.mxu1 %v268_v38 }
 0x2e9   :  { %1526 = vmatprep.subr.bf16.mxu1 %v1749_v0 }
 0x2ea   :  { %v311_v39 = vpop.permute.xlu1 %310 }
 0x2eb   :  { %v316_v40 = vsel %vm266_vm4, %v311_v39, 0 }
 0x2ec   :  { %1521 = vmatpush3.bf16.msra.mxu0 %v316_v40 }
 0x2ed   :  { %v1659_v41 = vpop.eup %1658  ;;  %1532 = vmatprep.subr.bf16.mxu0 %v1749_v0 }
 0x2ee   :  { %v249_v42 = vsel %vm142_vm3, %v1659_v41, 0.0  ;;  %v368_v45 = vpop.permute.xlu1 %367 }
 0x2ef   :  { %250 = vadd.xlane.f32.xlu0 %v249_v42  ;;  %v373_v52 = vsel %vm142_vm3, %v368_v45, 0 }
 0x2f1   :  { %v1661_v43 = vpop.eup %1660 }
 0x2f2   :  { %v252_v44 = vsel %vm142_vm3, %v1661_v43, 0.0 }
 0x2f3   :  { %253 = vadd.xlane.f32.xlu1 %v252_v44 }
 0x304   :  { %418 = vrot.lane.b32.xlu1 %v1885_v16, %s1752_s2 }
 0x305   :  { %365 = vrot.lane.b32.xlu0 %v1882_v15, %s1753_s30 }
 0x308   :  { %416 = vrot.lane.b32.xlu1 %v1885_v16, %s1753_s30 }
 0x37c   :  { %v251_v46 = vpop.xlane.xlu0 %250 }
 0x37d   :  { %1662 = vrcp.f32 %v251_v46 }
 0x380   :  { %v254_v47 = vpop.xlane.xlu1 %253  ;;  %v366_v57 = vpop.permute.xlu0 %365 }
 0x381   :  { %1664 = vrcp.f32 %v254_v47 }
 0x384   :  { %v419_v54 = vpop.permute.xlu1 %418 }
 0x385   :  { %v424_v56 = vsel %vm142_vm3, %v419_v54, 0 }
 0x387   :  { %v1663_v48 = vpop.eup %1662 }
 0x388   :  { %v257_v49 = vmul.f32 %v1663_v48, %v1659_v41  ;;  %v417_v58 = vpop.permute.xlu1 %416 }
 0x38a   :  { %v259_v50 = vpack.c.bf16 %v257_v49, %v257_v49 }
 0x38b   :  { %v1665_v51 = vpop.eup %1664 }
 0x38c   :  { %v258_v53 = vmul.f32 %v1665_v51, %v1661_v43  ;;  %1517 = vmatmul.mubr.msk.bf16.vlgmr.msra.gmra.mrb[4].mxu1 %vm142_vm3, %v259_v50 }
 0x38d   :  { %1527 = vmatpush3.bf16.xpose.msra.mxu1 %v373_v52  ;;  %1528 = vmatprep.mubr.msk.bf16.mxu1 %vm1750_vm0, %v1749_v0 }
 0x38e   :  { %v260_v55 = vpack.c.bf16 %v258_v53, %v258_v53  ;;  %1538 = vmatprep.subr.bf16.mxu1 %v1749_v0 }
 0x390   :  { %1523 = vmatmul.mubr.msk.bf16.vlgmr.msra.gmra.mrb[8].mxu0 %vm142_vm3, %v260_v55 }
 0x391   :  { %1533 = vmatpush3.bf16.xpose.msra.mxu0 %v424_v56  ;;  %1534 = vmatprep.mubr.msk.bf16.mxu0 %vm1750_vm0, %v1749_v0 }
 0x392   :  { %1544 = vmatprep.subr.bf16.mxu0 %v1749_v0 }
 0x394   :  { %1529 = vmatmul.mubr.msk.bf16.vlgmr.msra.gmra.mrb[8].mxu1 %vm142_vm3, %v366_v57 }
 0x395   :  { %1540 = vmatprep.mubr.msk.bf16.mxu1 %vm1750_vm0, %v1749_v0 }
 0x398   :  { %1535 = vmatmul.mubr.msk.bf16.vlgmr.msra.gmra.mrb[12].mxu0 %vm142_vm3, %v417_v58 }
 0x399   :  { %1546 = vmatprep.mubr.msk.bf16.mxu0 %vm1750_vm0, %v1749_v0 }
 0x45f   :  { %v304_v59 = vpop.f32.mrb[4].mxu1 }
 0x460   :  { %v1518_v60 = vpop.f32.mrb[5].mxu1 }
 0x461   :  { %v307_v61 = vpop.f32.mrb[6].mxu1 }
 0x462   :  { %v1519_v62 = vpop.f32.mrb[7].mxu1 }
 0x463   :  { %v352_v63 = vpop.f32.mrb[8].mxu0 }
 0x464   :  { %v358_v1 = vpack.c.bf16 %v352_v63, %v304_v59  ;;  %v1524_v2 = vpop.f32.mrb[9].mxu0 }
 0x465   :  { %v355_v5 = vpop.f32.mrb[10].mxu0 }
 0x466   :  { %359 = vst.msk [vmem:[#allocation3] sm:$0xff] %vm142_vm3, %v358_v1  ;;  %v1525_v6 = vpop.f32.mrb[11].mxu0 }
 0x467   :  { %v409_v7 = vpop.f32.mrb[8].mxu1 }
 0x468   :  { %v1530_v8 = vpop.f32.mrb[9].mxu1  ;;  %v466_v9 = vsel %vm142_vm3, %v409_v7, -inf }
 0x469   :  { %467 = vmax.xlane.f32.xlu1 %v466_v9  ;;  %v412_v10 = vpop.f32.mrb[10].mxu1 }
 0x46a   :  { %v1531_v11 = vpop.f32.mrb[11].mxu1 }
 0x46b   :  { %v460_v12 = vpop.f32.mrb[12].mxu0 }
 0x46c   :  { %v1536_v13 = vpop.f32.mrb[13].mxu0  ;;  %v469_v14 = vsel %vm142_vm3, %v460_v12, -inf }
 0x46d   :  { %470 = vmax.xlane.f32.xlu0 %v469_v14  ;;  %v463_v17 = vpop.f32.mrb[14].mxu0 }
 0x46e   :  { %v1537_v18 = vpop.f32.mrb[15].mxu0 }
 0x47a   :  { %490 = vrot.lane.b32.xlu1 %v1882_v15, %s1754_s14 }
 0x47e   :  { %600 = vrot.lane.b32.xlu1 %v1882_v15, %s1755_s15 }
 0x483   :  { %538 = vrot.lane.b32.xlu0 %v1885_v16, %s1754_s14 }
 0x487   :  { %598 = vrot.lane.b32.xlu0 %v1882_v15, %s1756_s16 }
 0x4f6   :  { %v468_v19 = vpop.xlane.xlu1 %467 }
 0x4f7   :  { %v472_v20 = vsub.f32 %v409_v7, %v468_v19 }
 0x4f9   :  { %v474_v21 = vmul.f32 1.442695, %v472_v20 }
 0x4fa   :  { %v491_v22 = vpop.permute.xlu1 %490  ;;  %v471_v23 = vpop.xlane.xlu0 %470 }
 0x4fb   :  { %1666 = vpow2.f32 %v474_v21  ;;  %v496_v24 = vsel %vm266_vm4, %v491_v22, 0  ;;  %v473_v25 = vsub.f32 %v460_v12, %v471_v23 }
 0x4fc   :  { %1539 = vmatpush3.bf16.msra.mxu1 %v496_v24 }
 0x4fd   :  { %v476_v26 = vmul.f32 1.442695, %v473_v25  ;;  %1550 = vmatprep.subr.bf16.mxu1 %v1749_v0 }
 0x4fe   :  { %v539_v27 = vpop.permute.xlu0 %538  ;;  %v601_v33 = vpop.permute.xlu1 %600 }
 0x4ff   :  { %1668 = vpow2.f32 %v476_v26  ;;  %v544_v28 = vsel %vm266_vm4, %v539_v27, 0  ;;  %v606_v40 = vsel %vm142_vm3, %v601_v33, 0 }
 0x500   :  { %1545 = vmatpush3.bf16.msra.mxu0 %v544_v28 }
 0x501   :  { %1556 = vmatprep.subr.bf16.mxu0 %v1749_v0 }
 0x502   :  { %v599_v45 = vpop.permute.xlu0 %598 }
 0x505   :  { %v1667_v29 = vpop.eup %1666 }
 0x506   :  { %v478_v30 = vsel %vm142_vm3, %v1667_v29, 0.0 }
 0x507   :  { %479 = vadd.xlane.f32.xlu1 %v478_v30 }
 0x509   :  { %v1669_v31 = vpop.eup %1668 }
 0x50a   :  { %v481_v32 = vsel %vm142_vm3, %v1669_v31, 0.0 }
 0x50b   :  { %482 = vadd.xlane.f32.xlu1 %v481_v32 }
 0x51c   :  { %651 = vrot.lane.b32.xlu1 %v1885_v16, %s1755_s15 }
 0x520   :  { %649 = vrot.lane.b32.xlu1 %v1885_v16, %s1756_s16 }
 0x594   :  { %v480_v34 = vpop.xlane.xlu1 %479 }
 0x595   :  { %1670 = vrcp.f32 %v480_v34 }
 0x598   :  { %v483_v35 = vpop.xlane.xlu1 %482 }
 0x599   :  { %1672 = vrcp.f32 %v483_v35 }
 0x59c   :  { %v652_v42 = vpop.permute.xlu1 %651 }
 0x59d   :  { %v657_v44 = vsel %vm142_vm3, %v652_v42, 0 }
 0x59f   :  { %v1671_v36 = vpop.eup %1670 }
 0x5a0   :  { %v486_v37 = vmul.f32 %v1671_v36, %v1667_v29  ;;  %v650_v46 = vpop.permute.xlu1 %649 }
 0x5a2   :  { %v488_v38 = vpack.c.bf16 %v486_v37, %v486_v37 }
 0x5a3   :  { %v1673_v39 = vpop.eup %1672 }
 0x5a4   :  { %v487_v41 = vmul.f32 %v1673_v39, %v1669_v31  ;;  %1541 = vmatmul.mubr.msk.bf16.vlgmr.msra.gmra.mrb[12].mxu1 %vm142_vm3, %v488_v38 }
 0x5a5   :  { %1551 = vmatpush3.bf16.xpose.msra.mxu1 %v606_v40  ;;  %1552 = vmatprep.mubr.msk.bf16.mxu1 %vm1750_vm0, %v1749_v0 }
 0x5a6   :  { %v489_v43 = vpack.c.bf16 %v487_v41, %v487_v41  ;;  %1562 = vmatprep.subr.bf16.mxu1 %v1749_v0 }
 0x5a8   :  { %1547 = vmatmul.mubr.msk.bf16.vlgmr.msra.gmra.mrb[16].mxu0 %vm142_vm3, %v489_v43 }
 0x5a9   :  { %1557 = vmatpush3.bf16.xpose.msra.mxu0 %v657_v44  ;;  %1558 = vmatprep.mubr.msk.bf16.mxu0 %vm1750_vm0, %v1749_v0 }
 0x5aa   :  { %1568 = vmatprep.subr.bf16.mxu0 %v1749_v0 }
 0x5ac   :  { %1553 = vmatmul.mubr.msk.bf16.vlgmr.msra.gmra.mrb[16].mxu1 %vm142_vm3, %v599_v45 }
 0x5ad   :  { %1564 = vmatprep.mubr.msk.bf16.mxu1 %vm1750_vm0, %v1749_v0 }
 0x5b0   :  { %1559 = vmatmul.mubr.msk.bf16.vlgmr.msra.gmra.mrb[20].mxu0 %vm142_vm3, %v650_v46 }
 0x5b1   :  { %1570 = vmatprep.mubr.msk.bf16.mxu0 %vm1750_vm0, %v1749_v0 }
 0x677   :  { %v1963_v47 = vpop.f32.mrb[12].mxu1 }
 0x678   :  { %v1542_v48 = vpop.f32.mrb[13].mxu1 }
 0x679   :  { %v535_v49 = vpop.f32.mrb[14].mxu1 }
 0x67a   :  { %v1543_v50 = vpop.f32.mrb[15].mxu1 }
 0x67b   :  { %v1965_v51 = vpop.f32.mrb[16].mxu0 }
 0x67c   :  { %v586_v52 = vpack.c.bf16 %v1965_v51, %v1963_v47  ;;  %v1548_v53 = vpop.f32.mrb[17].mxu0 }
 0x67d   :  { %v583_v54 = vpop.f32.mrb[18].mxu0 }
 0x67e   :  { %v1549_v55 = vpop.f32.mrb[19].mxu0 }
 0x67f   :  { %v642_v56 = vpop.f32.mrb[16].mxu1 }
 0x680   :  { %v1554_v57 = vpop.f32.mrb[17].mxu1  ;;  %v699_v58 = vsel %vm142_vm3, %v642_v56, -inf }
 0x681   :  { %700 = vmax.xlane.f32.xlu0 %v699_v58  ;;  %v645_v59 = vpop.f32.mrb[18].mxu1 }
 0x682   :  { %v1555_v60 = vpop.f32.mrb[19].mxu1 }
 0x683   :  { %v693_v61 = vpop.f32.mrb[20].mxu0 }
 0x684   :  { %v1560_v62 = vpop.f32.mrb[21].mxu0  ;;  %v702_v63 = vsel %vm142_vm3, %v693_v61, -inf }
 0x685   :  { %703 = vmax.xlane.f32.xlu1 %v702_v63  ;;  %v696_v1 = vpop.f32.mrb[22].mxu0 }
 0x686   :  { %v1561_v2 = vpop.f32.mrb[23].mxu0 }
 0x696   :  { %723 = vrot.lane.b32.xlu1 %v1882_v15, %s1757_s17 }
 0x69a   :  { %833 = vrot.lane.b32.xlu1 %v1882_v15, %s1758_s18 }
 0x69e   :  { %884 = vrot.lane.b32.xlu1 %v1885_v16, %s1758_s18 }
 0x6a2   :  { %882 = vrot.lane.b32.xlu1 %v1885_v16, %s1759_s19 }
 0x70e   :  { %v701_v5 = vpop.xlane.xlu0 %700 }
 0x70f   :  { %v705_v6 = vsub.f32 %v642_v56, %v701_v5 }
 0x711   :  { %v707_v7 = vmul.f32 1.442695, %v705_v6 }
 0x712   :  { %v704_v8 = vpop.xlane.xlu1 %703 }
 0x713   :  { %1674 = vpow2.f32 %v707_v7  ;;  %v706_v9 = vsub.f32 %v693_v61, %v704_v8 }
 0x715   :  { %v709_v10 = vmul.f32 1.442695, %v706_v9 }
 0x716   :  { %v724_v11 = vpop.permute.xlu1 %723 }
 0x717   :  { %1676 = vpow2.f32 %v709_v10  ;;  %v729_v12 = vsel %vm266_vm4, %v724_v11, 0 }
 0x718   :  { %1563 = vmatpush3.bf16.msra.mxu1 %v729_v12 }
 0x719   :  { %1574 = vmatprep.subr.bf16.mxu1 %v1749_v0 }
 0x71a   :  { %v834_v24 = vpop.permute.xlu1 %833 }
 0x71b   :  { %v839_v28 = vsel %vm142_vm3, %v834_v24, 0 }
 0x71d   :  { %v1675_v13 = vpop.eup %1674 }
 0x71e   :  { %v711_v14 = vsel %vm142_vm3, %v1675_v13, 0.0  ;;  %v885_v30 = vpop.permute.xlu1 %884 }
 0x71f   :  { %712 = vadd.xlane.f32.xlu0 %v711_v14  ;;  %v890_v32 = vsel %vm142_vm3, %v885_v30, 0  ;;  %v1430_v30 = vld [vmem:[%s2097_s4] ss:$0 sm:$0xff] }
 0x721   :  { %v1677_v17 = vpop.eup %1676 }
 0x722   :  { %v714_v18 = vsel %vm142_vm3, %v1677_v17, 0.0  ;;  %v883_v34 = vpop.permute.xlu1 %882 }
 0x723   :  { %715 = vadd.xlane.f32.xlu0 %v714_v18  ;;  %v1651_v18 = vld [vmem:[%s2096_s3 + $0x8] sm:$0xff]  }
 0x739   :  { %771 = vrot.lane.b32.xlu0 %v1885_v16, %s1757_s17 }
 0x73d   :  { %831 = vrot.lane.b32.xlu0 %v1882_v15, %s1759_s19 }
 0x7ac   :  { %v713_v19 = vpop.xlane.xlu0 %712 }
 0x7ad   :  { %1678 = vrcp.f32 %v713_v19 }
 0x7b0   :  { %v716_v20 = vpop.xlane.xlu0 %715 }
 0x7b1   :  { %1680 = vrcp.f32 %v716_v20 }
 0x7b4   :  { %v772_v21 = vpop.permute.xlu0 %771 }
 0x7b5   :  { %v777_v22 = vsel %vm266_vm4, %v772_v21, 0 }
 0x7b6   :  { %1569 = vmatpush3.bf16.msra.mxu0 %v777_v22 }
 0x7b7   :  { %v1679_v23 = vpop.eup %1678  ;;  %1580 = vmatprep.subr.bf16.mxu0 %v1749_v0 }
 0x7b8   :  { %v719_v25 = vmul.f32 %v1679_v23, %v1675_v13  ;;  %v832_v33 = vpop.permute.xlu0 %831 }
 0x7ba   :  { %v721_v26 = vpack.c.bf16 %v719_v25, %v719_v25 }
 0x7bb   :  { %v1681_v27 = vpop.eup %1680 }
 0x7bc   :  { %v720_v29 = vmul.f32 %v1681_v27, %v1677_v17  ;;  %1565 = vmatmul.mubr.msk.bf16.vlgmr.msra.gmra.mrb[20].mxu1 %vm142_vm3, %v721_v26  ;;  %v1650_v17 = vld [vmem:[%s2096_s3] sm:$0xff]  }
 0x7bd   :  { %1575 = vmatpush3.bf16.xpose.msra.mxu1 %v839_v28  ;;  %1576 = vmatprep.mubr.msk.bf16.mxu1 %vm1750_vm0, %v1749_v0 }
 0x7be   :  { %v722_v31 = vpack.c.bf16 %v720_v29, %v720_v29  ;;  %1586 = vmatprep.subr.bf16.mxu1 %v1749_v0 }
 0x7c0   :  { %1571 = vmatmul.mubr.msk.bf16.vlgmr.msra.gmra.mrb[24].mxu0 %vm142_vm3, %v722_v31 }
 0x7c1   :  { %1581 = vmatpush3.bf16.xpose.msra.mxu0 %v890_v32  ;;  %1582 = vmatprep.mubr.msk.bf16.mxu0 %vm1750_vm0, %v1749_v0 }
 0x7c2   :  { %1592 = vmatprep.subr.bf16.mxu0 %v1749_v0 }
 0x7c4   :  { %1577 = vmatmul.mubr.msk.bf16.vlgmr.msra.gmra.mrb[24].mxu1 %vm142_vm3, %v832_v33 }
 0x7c5   :  { %1588 = vmatprep.mubr.msk.bf16.mxu1 %vm1750_vm0, %v1749_v0 }
 0x7c8   :  { %1583 = vmatmul.mubr.msk.bf16.vlgmr.msra.gmra.mrb[28].mxu0 %vm142_vm3, %v883_v34 }
 0x7c9   :  { %1594 = vmatprep.mubr.msk.bf16.mxu0 %vm1750_vm0, %v1749_v0 }
 0x88f   :  { %v765_v35 = vpop.f32.mrb[20].mxu1 }
 0x890   :  { %v1566_v36 = vpop.f32.mrb[21].mxu1 }
 0x891   :  { %v768_v37 = vpop.f32.mrb[22].mxu1 }
 0x892   :  { %v1567_v38 = vpop.f32.mrb[23].mxu1 }
 0x893   :  { %v813_v39 = vpop.f32.mrb[24].mxu0 }
 0x894   :  { %v819_v40 = vpack.c.bf16 %v813_v39, %v765_v35  ;;  %v1572_v41 = vpop.f32.mrb[25].mxu0 }
 0x895   :  { %v816_v42 = vpop.f32.mrb[26].mxu0 }
 0x896   :  { %v1573_v43 = vpop.f32.mrb[27].mxu0 }
 0x897   :  { %v875_v44 = vpop.f32.mrb[24].mxu1 }
 0x898   :  { %v1578_v45 = vpop.f32.mrb[25].mxu1  ;;  %v932_v46 = vsel %vm142_vm3, %v875_v44, -inf }
 0x899   :  { %933 = vmax.xlane.f32.xlu0 %v932_v46  ;;  %v878_v48 = vpop.f32.mrb[26].mxu1  ;;  %v1652_v45 = vld [vmem:[#allocation4] sm:$0xff]   ;;  %v1655_v46 = vld [vmem:[%s2100_s7 + $0x8] sm:$0xff]  }
 0x89a   :  { %v1579_v49 = vpop.f32.mrb[27].mxu1 }
 0x89b   :  { %v926_v50 = vpop.f32.mrb[28].mxu0 }
 0x89c   :  { %v1584_v53 = vpop.f32.mrb[29].mxu0  ;;  %v935_v54 = vsel %vm142_vm3, %v926_v50, -inf }
 0x89d   :  { %936 = vmax.xlane.f32.xlu1 %v935_v54  ;;  %v929_v55 = vpop.f32.mrb[30].mxu0 }
 0x89e   :  { %v1585_v56 = vpop.f32.mrb[31].mxu0 }
 0x8ae   :  { %956 = vrot.lane.b32.xlu1 %v1882_v15, %s1760_s20 }
 0x8b2   :  { %588 = vrot.lane.b32.xlu1 %v586_v52, %s1761_s21 }
 0x8b6   :  { %821 = vrot.lane.b32.xlu1 %v819_v40, %s1762_s22 }
 0x926   :  { %v934_v57 = vpop.xlane.xlu0 %933 }
 0x927   :  { %v938_v58 = vsub.f32 %v875_v44, %v934_v57 }
 0x929   :  { %v940_v59 = vmul.f32 1.442695, %v938_v58 }
 0x92a   :  { %v937_v60 = vpop.xlane.xlu1 %936 }
 0x92b   :  { %1682 = vpow2.f32 %v940_v59  ;;  %v939_v61 = vsub.f32 %v926_v50, %v937_v60 }
 0x92d   :  { %v942_v62 = vmul.f32 1.442695, %v939_v61 }
 0x92e   :  { %v957_v63 = vpop.permute.xlu1 %956 }
 0x92f   :  { %1684 = vpow2.f32 %v942_v62  ;;  %v962_v1 = vsel %vm266_vm4, %v957_v63, 0 }
 0x930   :  { %1587 = vmatpush3.bf16.msra.mxu1 %v962_v1 }
 0x931   :  { %1598 = vmatprep.subr.bf16.mxu1 %v1749_v0 }
 0x932   :  { %v589_v15 = vpop.permute.xlu1 %588 }
 0x933   :  { %592 = vst.msk [vmem:[#allocation3] sm:$0xff] %vm591_vm5, %v589_v15 }
 0x935   :  { %v1683_v47 = vpop.eup %1682 }
 0x936   :  { %v822_v51 = vpop.permute.xlu1 %821  ;;  %v944_v52 = vsel %vm142_vm3, %v1683_v47, 0.0 }
 0x937   :  { %825 = vst.msk [vmem:[#allocation3] sm:$0xff] %vm824_vm6, %v822_v51  ;;  %945 = vadd.xlane.f32.xlu0 %v944_v52 }
 0x939   :  { %v1685_v2 = vpop.eup %1684 }
 0x93a   :  { %v947_v5 = vsel %vm142_vm3, %v1685_v2, 0.0 }
 0x93b   :  { %948 = vadd.xlane.f32.xlu0 %v947_v5 }
 0x951   :  { %1004 = vrot.lane.b32.xlu0 %v1885_v16, %s1760_s20 }
 0x9c4   :  { %v946_v6 = vpop.xlane.xlu0 %945 }
 0x9c5   :  { %1686 = vrcp.f32 %v946_v6 }
 0x9c8   :  { %v949_v7 = vpop.xlane.xlu0 %948 }
 0x9c9   :  { %1688 = vrcp.f32 %v949_v7  ;;  %v1435_v7 = vld [vmem:[%s2103_s10] ss:$0 sm:$0xff] }
 0x9cc   :  { %v1005_v8 = vpop.permute.xlu0 %1004 }
 0x9cd   :  { %v1010_v9 = vsel %vm266_vm4, %v1005_v8, 0 }
 0x9ce   :  { %1593 = vmatpush3.bf16.msra.mxu0 %v1010_v9 }
 0x9cf   :  { %v1687_v10 = vpop.eup %1686  ;;  %1606 = vmatprep.subr.bf16.mxu0 %v1749_v0 }
 0x9d0   :  { %v952_v11 = vmul.f32 %v1687_v10, %v1683_v47  ;;  %v1434_v47 = vld [vmem:[%s2102_s9] ss:$0 sm:$0xff] }
 0x9d2   :  { %v954_v12 = vpack.c.bf16 %v952_v11, %v952_v11 }
 0x9d3   :  { %v1689_v13 = vpop.eup %1688 }
 0x9d4   :  { %v953_v14 = vmul.f32 %v1689_v13, %v1685_v2  ;;  %1589 = vmatmul.mubr.msk.bf16.vlgmr.msra.gmra.mrb[28].mxu1 %vm142_vm3, %v954_v12  ;;  %v1656_v12 = vld [vmem:[%s2100_s7 + $0x10] sm:$0xff]   ;;  %v1657_v13 = vld [vmem:[%s2100_s7 + $0x18] sm:$0xff]  }
 0x9d5   :  { %1602 = vmatprep.mubr.msk.bf16.mxu1 %vm1750_vm0, %v1749_v0  ;;  %1599 = vmatpush3.bf16.msra.mxu1 %v1650_v17 }
 0x9d6   :  { %v955_v16 = vpack.c.bf16 %v953_v14, %v953_v14  ;;  %1600 = vmatprep.subr.bf16.mxu1 %v1749_v0  ;;  %v1436_v14 = vld [vmem:[%s2099_s6] ss:$0 sm:$0xff] }
 0x9d8   :  { %1595 = vmatmul.mubr.msk.bf16.vlgmr.msra.gmra.mrb[32].mxu0 %vm142_vm3, %v955_v16 }
 0x9d9   :  { %1610 = vmatprep.mubr.msk.bf16.mxu0 %vm1750_vm0, %v1749_v0  ;;  %1601 = vmatpush3.bf16.msra.mxu1 %v1651_v18 }
 0x9da   :  { %1614 = vmatprep.subr.bf16.mxu1 %v1749_v0  ;;  %1607 = vmatpush3.bf16.msra.mxu0 %v1652_v45 }
 0x9db   :  { %1608 = vmatprep.subr.bf16.mxu0 %v1749_v0 }
 0xaa7   :  { %v998_v19 = vpop.f32.mrb[28].mxu1 }
 0xaa8   :  { %v1590_v20 = vpop.f32.mrb[29].mxu1 }
 0xaa9   :  { %v1001_v21 = vpop.f32.mrb[30].mxu1 }
 0xaaa   :  { %v1591_v22 = vpop.f32.mrb[31].mxu1 }
 0xaab   :  { %v1046_v23 = vpop.f32.mrb[32].mxu0 }
 0xaac   :  { %v1052_v24 = vpack.c.bf16 %v1046_v23, %v998_v19  ;;  %v1596_v25 = vpop.f32.mrb[33].mxu0 }
 0xaad   :  { %v1049_v26 = vpop.f32.mrb[34].mxu0 }
 0xaae   :  { %1054 = vrot.lane.b32.xlu0 %v1052_v24, %s1763_s26  ;;  %v1597_v27 = vpop.f32.mrb[35].mxu0 }
 0xb20   :  { %v1055_v28 = vpop.permute.xlu0 %1054 }
 0xb21   :  { %1058 = vst.msk [vmem:[#allocation3] sm:$0xff] %vm1057_vm7, %v1055_v28 }
 0xb28   :  { %v1059_v29 = vld [vmem:[#allocation3] sm:$0xff] }
 0xb29   :  { %1603 = vmatmul.mubr.msk.bf16.vlgmr.msra.gmra.mrb[32].mxu1 %vm86_vm1, %v1059_v29 }
 0xb2a   :  { %1622 = vmatprep.mubr.msk.bf16.mxu1 %vm1750_vm0, %v1749_v0 }
 0xbfc   :  { %v1120_v31 = vpop.f32.mrb[32].mxu1 }
 0xbfd   :  { %v1121_v32 = vadd.f32 %v1430_v30, %v1120_v31  ;;  %v1604_v33 = vpop.f32.mrb[33].mxu1 }
 0xbfe   :  { %v1123_v34 = vpop.f32.mrb[34].mxu1 }
 0xbff   :  { %v1127_v35 = vadd.f32 %v1121_v32, %v1865_v3  ;;  %v1124_v36 = vadd.f32 %v1430_v30, %v1123_v34  ;;  %v1605_v37 = vpop.f32.mrb[35].mxu1  ;;  %v1653_v3 = vld [vmem:[#allocation4 + $0x8] sm:$0xff]  }
 0xc00   :  { %1609 = vmatpush3.bf16.msra.mxu0 %v1653_v3 }
 0xc01   :  { %v1128_v38 = vadd.f32 %v1124_v36, %v1870_v4  ;;  %v1129_v39 = vsel %vm86_vm1, %v1127_v35, 0.0  ;;  %v1138_v42 = vmul.f32 %v1127_v35, %v1127_v35  ;;  %v1654_v4 = vld [vmem:[%s2100_s7] sm:$0xff]  }
 0xc02   :  { %1130 = vadd.xlane.f32.xlu1 %v1129_v39  ;;  %1615 = vmatpush3.bf16.msra.mxu1 %v1654_v4 }
 0xc03   :  { %v1132_v40 = vsel %vm86_vm1, %v1128_v38, 0.0  ;;  %v1139_v41 = vmul.f32 %v1128_v38, %v1128_v38  ;;  %v1140_v44 = vsel %vm86_vm1, %v1138_v42, 0.0  ;;  %1616 = vmatprep.subr.bf16.mxu1 %v1749_v0 }
 0xc04   :  { %1133 = vadd.xlane.f32.xlu0 %v1132_v40 }
 0xc05   :  { %v1143_v43 = vsel %vm86_vm1, %v1139_v41, 0.0 }
 0xc06   :  { %1144 = vadd.xlane.f32.xlu1 %v1143_v43  ;;  %1617 = vmatpush3.bf16.msra.mxu1 %v1655_v46 }
 0xc07   :  { %1618 = vmatprep.subr.bf16.mxu1 %v1749_v0 }
 0xc08   :  { %1141 = vadd.xlane.f32.xlu0 %v1140_v44 }
 0xc0a   :  { %1619 = vmatpush3.bf16.msra.mxu1 %v1656_v12 }
 0xc0b   :  { %1620 = vmatprep.subr.bf16.mxu1 %v1749_v0  ;;  %v1440_v0 = vld [vmem:[%s2101_s8] ss:$0 sm:$0xff] }
 0xc0e   :  { %1621 = vmatpush3.bf16.msra.mxu1 %v1657_v13 }
 0xc8f   :  { %v1131_v48 = vpop.xlane.xlu1 %1130 }
 0xc90   :  { %v1136_v50 = vmul.f32 0.03125, %v1131_v48 }
 0xc91   :  { %v1134_v49 = vpop.xlane.xlu0 %1133 }
 0xc92   :  { %v1137_v53 = vmul.f32 0.03125, %v1134_v49  ;;  %v1148_v58 = vmul.f32 %v1136_v50, %v1136_v50  ;;  %v1152_v51 = vsub.f32 %v1127_v35, %v1136_v50 }
 0xc93   :  { %v1145_v54 = vpop.xlane.xlu1 %1144 }
 0xc94   :  { %v1149_v55 = vmul.f32 %v1137_v53, %v1137_v53  ;;  %v1147_v56 = vmul.f32 0.03125, %v1145_v54  ;;  %v1153_v1 = vsub.f32 %v1128_v38, %v1137_v53 }
 0xc95   :  { %v1142_v57 = vpop.xlane.xlu0 %1141 }
 0xc96   :  { %v1151_v59 = vsub.f32 %v1147_v56, %v1149_v55  ;;  %v1146_v60 = vmul.f32 0.03125, %v1142_v57  ;;  %v1446_v56 = vld [vmem:[%s2104_s11] ss:$0 sm:$0xff]  ;;  %s1720_s11 = scalar_lea.vmem %s1391_s5, 256 }
 0xc97   :  { %p1721_p8 = scmp.ne.s32.totalorder %s1391_s5, %s1720_s11  ;;  %p1726_p10 = scmp.lt.s32.totalorder %s1720_s11, %s1720_s11 }
 0xc98   :  { %v1155_v61 = vadd.f32 1e-05, %v1151_v59  ;;  %v1150_v62 = vsub.f32 %v1146_v60, %v1148_v58  ;;  %v1447_v60 = vld [vmem:[%s2105_s12] ss:$0 sm:$0xff] }
 0xc99   :  { %p1727_p11 = por %p1726_p10, %p1725_p9 }
 0xc9a   :  { %1690 = vrsqrt.f32 %v1155_v61  ;;  %v1154_v63 = vadd.f32 1e-05, %v1150_v62 }
 0xc9b   :  { %p1728_p12 = pnand %p1727_p11, %p1721_p8 }
 0xc9c   :  { %1692 = vrsqrt.f32 %v1154_v63 }
 0xca4   :  { %v1691_v15 = vpop.eup %1690 }
 0xca5   :  { %v1159_v52 = vmul.f32 %v1691_v15, %v1153_v1 }
 0xca6   :  { %v1693_v2 = vpop.eup %1692 }
 0xca7   :  { %v1158_v5 = vmul.f32 %v1693_v2, %v1152_v51  ;;  %v1168_v6 = vmul.f32 %v1434_v47, %v1159_v52 }
 0xca9   :  { %v1167_v8 = vmul.f32 %v1434_v47, %v1158_v5  ;;  %v1177_v10 = vadd.f32 %v1435_v7, %v1168_v6 }
 0xcab   :  { %v1176_v9 = vadd.f32 %v1435_v7, %v1167_v8 }
 0xcad   :  { %v1178_v11 = vpack.c.bf16 %v1177_v10, %v1176_v9 }
 0xcaf   :  { %1611 = vmatmul.mubr.msk.bf16.vlgmr.msra.gmra.mrb[36].mxu0 %vm86_vm1, %v1178_v11 }
 0xd82   :  { %v1239_v16 = vpop.f32.mrb[36].mxu0 }
 0xd83   :  { %v1240_v17 = vadd.f32 %v1436_v14, %v1239_v16  ;;  %v1612_v18 = vpop.f32.mrb[37].mxu0 }
 0xd84   :  { %v1242_v19 = vpop.f32.mrb[38].mxu0 }
 0xd85   :  { %v1243_v20 = vadd.f32 %v1436_v14, %v1242_v19  ;;  %v1613_v21 = vpop.f32.mrb[39].mxu0  ;;  %v1246_v22 = vmax.f32 %v1240_v17, 0.0 }
 0xd87   :  { %v1247_v23 = vmax.f32 %v1243_v20, 0.0 }
 0xd89   :  { %v1248_v24 = vpack.c.bf16 %v1247_v23, %v1246_v22 }
 0xd8b   :  { %1623 = vmatmul.mubr.msk.bf16.vlgmr.msra.gmra.mrb[36].mxu1 %vm1288_vm8, %v1248_v24 }
 0xe5e   :  { %v1326_v25 = vpop.f32.mrb[36].mxu1 }
 0xe5f   :  { %v1327_v26 = vadd.f32 %v1440_v0, %v1326_v25  ;;  %v1624_v27 = vpop.f32.mrb[37].mxu1 }
 0xe60   :  { %v1329_v28 = vpop.f32.mrb[38].mxu1 }
 0xe61   :  { %v1333_v29 = vadd.f32 %v1327_v26, %v1176_v9  ;;  %v1330_v30 = vadd.f32 %v1440_v0, %v1329_v28  ;;  %v1625_v31 = vpop.f32.mrb[39].mxu1 }
 0xe63   :  { %v1334_v32 = vadd.f32 %v1330_v30, %v1177_v10  ;;  %v1335_v33 = vsel %vm86_vm1, %v1333_v29, 0.0  ;;  %v1343_v34 = vmul.f32 %v1333_v29, %v1333_v29 }
 0xe64   :  { %1336 = vadd.xlane.f32.xlu0 %v1335_v33 }
 0xe65   :  { %v1338_v35 = vsel %vm86_vm1, %v1334_v32, 0.0  ;;  %v1344_v36 = vmul.f32 %v1334_v32, %v1334_v32  ;;  %v1345_v37 = vsel %vm86_vm1, %v1343_v34, 0.0 }
 0xe66   :  { %1339 = vadd.xlane.f32.xlu1 %v1338_v35 }
 0xe67   :  { %v1348_v38 = vsel %vm86_vm1, %v1344_v36, 0.0 }
 0xe68   :  { %1346 = vadd.xlane.f32.xlu0 %v1345_v37 }
 0xe6a   :  { %1349 = vadd.xlane.f32.xlu1 %v1348_v38 }
 0xef1   :  { %v1337_v39 = vpop.xlane.xlu0 %1336 }
 0xef2   :  { %v1341_v40 = vmul.f32 0.03125, %v1337_v39 }
 0xef3   :  { %v1340_v41 = vpop.xlane.xlu1 %1339 }
 0xef4   :  { %v1342_v42 = vmul.f32 0.03125, %v1340_v41  ;;  %v1353_v44 = vmul.f32 %v1341_v40, %v1341_v40  ;;  %v1357_v54 = vsub.f32 %v1333_v29, %v1341_v40 }
 0xef5   :  { %v1347_v43 = vpop.xlane.xlu0 %1346 }
 0xef6   :  { %v1351_v45 = vmul.f32 0.03125, %v1347_v43  ;;  %v1354_v4 = vmul.f32 %v1342_v42, %v1342_v42  ;;  %v1358_v57 = vsub.f32 %v1334_v32, %v1342_v42 }
 0xef7   :  { %v1350_v3 = vpop.xlane.xlu1 %1349 }
 0xef8   :  { %v1355_v46 = vsub.f32 %v1351_v45, %v1353_v44  ;;  %v1352_v48 = vmul.f32 0.03125, %v1350_v3 }
 0xefa   :  { %v1359_v49 = vadd.f32 1e-05, %v1355_v46  ;;  %v1356_v50 = vsub.f32 %v1352_v48, %v1354_v4 }
 0xefc   :  { %1694 = vrsqrt.f32 %v1359_v49  ;;  %v1360_v53 = vadd.f32 1e-05, %v1356_v50 }
 0xefe   :  { %1696 = vrsqrt.f32 %v1360_v53 }
 0xf06   :  { %v1695_v55 = vpop.eup %1694 }
 0xf07   :  { %v1363_v58 = vmul.f32 %v1695_v55, %v1357_v54 }
 0xf08   :  { %v1697_v59 = vpop.eup %1696 }
 0xf09   :  { %v1364_v61 = vmul.f32 %v1697_v59, %v1358_v57  ;;  %v1372_v62 = vmul.f32 %v1446_v56, %v1363_v58 }
 0xf0b   :  { %v1373_v63 = vmul.f32 %v1446_v56, %v1364_v61  ;;  %v1381_v1 = vadd.f32 %v1447_v60, %v1372_v62 }
 0xf0d   :  { %v1382_v15 = vadd.f32 %v1447_v60, %v1373_v63  ;;  %1383 = vst.msk [vmem:[#allocation7] sm:$0xff] %vm86_vm1, %v1381_v1 }
 0xf0f   :  { %1384 = vst.msk [vmem:[#allocation7 + $0x8] sm:$0xff] %vm86_vm1, %v1382_v15 }
 0xf10   :  { %1731 = shalt.err (!%p1728_p12)
}
 0xf11   :  { %s1732_s25 = scalar_lea.hbm %s2106_s13, 256 }
 0xf12   :  { %p1733_p13 = scmp.ne.s32.totalorder %s2106_s13, %s1732_s25  ;;  %p1736_p0 = scmp.lt.u32.totalorder %s1732_s25, %s2106_s13 }
 0xf14   :  { %p1738_p1 = pnand %p1736_p0, %p1733_p13 }
 0xf16   :  { %1741 = shalt.err (!%p1738_p1)
}
 0xf17   :  { %s1765_s28 = smov 128  }
 0xf18   :  { %1396 = dma.vmem_to_hbm [thread:$0]  %s1391_s5, 256, %s2106_s13, [#allocation6], %s1765_s28, %s1765_s28, %s1761_s21  }
 0xf19   :  { %1744 = dma.done.wait [#allocation6], 256  }
 0xf1a   :  { %1745 = vsyncadd [#allocation6], 4294967040 }
 0xf1b   :  { %1400 = vsyncpa [#allocation5], 1 }
 0xf1c   :  { %1401 = vsyncpa [#allocation6], 1 }

</bundles_post_ra>
